<compile_context>
chip_gen: v7x
topology: tpu7x:2x2x1
jax: 0.10.0
libtpu: 0.0.40
codegen_flags: <defaults>
</compile_context>

<pallas_src>
import functools

import jax
import jax.numpy as jnp
from jax.experimental import pallas as pl
from jax.experimental.pallas import tpu as pltpu


def gnn_kernel(itau_ref, x_ref, mu_ref, ma_ref, gs_ref, *refs, cfg):
    """refs = packed weight slabs (grouped by K) + (fused [2*mc, N] output)."""
    w_refs = refs[:-1]
    out_ref = refs[-1]

    U = cfg["num_users"]
    A = cfg["num_aps"]
    pf = cfg["phi_feature_dim"]
    gf = cfg["gamma_feature_dim"]
    mc = cfg["max_conns_ap"]
    N = cfg["lanes"]                   # bb * U * A lanes per grid step
    MIX = cfg["mix_lanes"]             # fixed lane width of the mixing constants
    pieces = cfg["pieces"]             # static (slab_idx, row_lo, rows) per piece
    mm_dtype = cfg["matmul_dtype"]

    cursor = [0]

    def take():
        # Weight pieces are consumed strictly in wrapper order as static row
        # slices of a few packed slabs (short live ranges, no vreg pinning).
        si, lo, n = pieces[cursor[0]]
        cursor[0] += 1
        return w_refs[si][lo:lo + n, :]

    def mm(w, v):
        # bf16 (v6e/v7x-native) MXU matmul with f32 accumulation.
        return jnp.dot(w.astype(mm_dtype), v.astype(mm_dtype),
                       preferred_element_type=jnp.float32)

    def mix(v, m_ref):
        # (ones - eye)/(n-1) mixing as a block-diagonal lane-space matmul.  The
        # constant stays [MIX, MIX] (independent of batch block size): wider
        # lane blocks are mixed per MIX-lane tile.
        m = m_ref[...]
        if N == MIX:
            return mm(v, m)
        return jnp.concatenate(
            [mm(v[:, t * MIX:(t + 1) * MIX], m) for t in range(N // MIX)],
            axis=1)

    mix_users = lambda v: mix(v, mu_ref)
    mix_aps = lambda v: mix(v, ma_ref)

    x_aug = x_ref[...]                     # [cin+1, N]; last row = ones (bias lane)
    ones = jnp.ones((1, N), jnp.float32)

    def phi(node):
        # conv1 as ONE matmul: activations concatenated along sublanes at
        # 8-aligned offsets, bias folded via the ones row inside x_aug.
        gin = x_aug if node is None else jnp.concatenate([node, x_aug], axis=0)
        h = jnp.maximum(mm(take(), gin), 0.0)                         # conv1+b1, ReLU
        c = jnp.concatenate([h[:pf, :], mix_users(h[pf:, :]), ones], axis=0)
        h2 = mm(take(), c)                                            # conv2+b2
        return jnp.concatenate([h2[:pf, :], mix_users(h2[pf:, :])], axis=0)

    def gamma(node, msgs, final):
        agg = mix_aps(msgs)                                           # msg aggregation
        if node is None:
            gin = jnp.concatenate([agg, x_aug], axis=0)
        else:
            gin = jnp.concatenate([node, agg, ones], axis=0)
        g = jnp.maximum(mm(take(), gin), 0.0)                         # conv1+b1, ReLU
        c = jnp.concatenate([g[:gf, :], mix_users(g[gf:, :]), ones], axis=0)
        g2 = mm(take(), c)                                            # conv2+b2
        if final:
            return g2
        q = jnp.maximum(g2, 0.0)
        return jnp.concatenate([q[:gf, :], mix_users(q[gf:, :])], axis=0)

    msgs = phi(None)                       # GNN layer 0 (phi1 weight folds [x, x])
    node = gamma(None, msgs, final=False)
    for i in range(1, 5):
        msgs = phi(node)
        node = gamma(node, msgs, final=(i == 4))
    r = node                               # [mc, N]

    # ---- deterministic gumbel softmax over the user axis (lane-dense) ----
    # Stride-A circular max butterfly: every shift is a multiple of A, so it
    # only mixes lanes that share the same AP index.  After ceil(log2(bb*U))
    # steps every lane holds the max over its whole (ap, sublane) column; that
    # value is constant within each softmax group and >= the group max, so exp
    # never overflows and the softmax is mathematically identical to the
    # reference's per-group max subtraction.
    # TODO(synk): the reference's data-dependent `while any(isinf(y/tau)):
    # tau *= 1.1` rescue loop is skipped; with the tau >= 1e-3 clamp it never
    # triggers for finite activations.
    itau = itau_ref[0, 0]                  # scalar from SMEM: 1 / clamp(tau, 1e-3)
    m = r
    shift = A
    while shift < N:                       # 2^k < bb*U  <=>  shift < N
        m = jnp.maximum(m, pltpu.roll(m, shift=shift, axis=1))
        shift *= 2
    e = jnp.exp((r - m) * itau)            # one full-width EUP op
    # Exact group denominator via one f32 MXU matmul with the 0/1 same-(batch,
    # ap) membership matrix, so `assignment` normalizes to 1 at f32 accuracy.
    gmat = gs_ref[...]
    if N == MIX:
        den = jnp.dot(e, gmat, preferred_element_type=jnp.float32)
    else:
        den = jnp.concatenate(
            [jnp.dot(e[:, t * MIX:(t + 1) * MIX], gmat,
                     preferred_element_type=jnp.float32)
             for t in range(N // MIX)], axis=1)
    den = jnp.maximum(den, 1e-30)          # guard against full exp underflow
    asn = e * pl.reciprocal(den)           # exact reciprocal
    # ONE sublane-dense, unmasked [2*mc, N] store carrying both outputs.
    out_ref[...] = jnp.concatenate([r, asn], axis=0)


def _pick_batch_block(B, U, A):
    """(bb, pad): (B+pad) % bb == 0, bb*U*A >= 128 whenever possible (lane-dense
    unmasked stores), <= ~1024 lanes per step (amortize the ~0.35us grid-step
    overhead without bloating tiles), and prefer >= 2 grid steps so multi-
    TensorCore chips can shard the 'parallel' axis."""
    per = U * A
    need = max(1, -(-128 // per))
    cap = max(need, 1024 // per)
    divs = [d for d in range(1, B + 1) if B % d == 0 and d <= cap]
    good = [d for d in divs if d >= need]
    if good:
        multi = [d for d in good if B // d >= 2]
        return (max(multi) if multi else max(good)), 0
    bb = need                               # pad the batch so every block stays lane-dense
    return bb, (-B) % bb


def _pick_mix_block(bb, U, A):
    """Smallest divisor of bb whose lane width reaches >= 128 lanes, so the
    mixing constants stay ~[128, 128] regardless of batch block size (v7x VMEM)."""
    per = U * A
    for d in range(1, bb + 1):
        if bb % d == 0 and d * per >= 128:
            return d
    return bb


def _lane_constants(mix_bb, U, A, mm_dtype):
    n = mix_bb * U * A
    idx = jnp.arange(n)
    b = idx // (U * A)
    u = (idx // A) % U
    a = idx % A
    same_b = b[:, None] == b[None, :]
    same_u = u[:, None] == u[None, :]
    same_a = a[:, None] == a[None, :]
    mu = (same_b & same_a & (~same_u)).astype(jnp.float32) / float(U - 1)
    ma = (same_b & same_u & (~same_a)).astype(jnp.float32) / float(A - 1)
    gs = (same_b & same_a).astype(jnp.float32)   # softmax group membership (incl. self)
    return mu.astype(mm_dtype), ma.astype(mm_dtype), gs


def _prepare_params(weights, cfg, mm_dtype):
    """Transpose to [Cout, Cin], fold biases in as a trailing column, reorder
    conv1 columns to match the in-kernel activation concat order, and pack the
    pieces into a few [rows, K] slabs grouped by K so the kernel has a handful
    of VMEM inputs and takes zero-cost static row slices."""
    cin = cfg["input_feature_dim"]
    pf = cfg["phi_feature_dim"]
    gf = cfg["gamma_feature_dim"]

    def wt(w):
        return jnp.asarray(w, jnp.float32).T                  # [cout, cin_total]

    def bcol(b):
        return jnp.asarray(b, jnp.float32).reshape(1, -1).T   # [cout, 1]

    phis = [tuple(weights[4 * i: 4 * i + 4]) for i in range(5)]
    gammas = [tuple(weights[20 + 4 * i: 20 + 4 * i + 4]) for i in range(5)]

    def phi_pieces(i):
        w1, b1, w2, b2 = phis[i]
        w1t, w2t = wt(w1), wt(w2)
        if i == 0:
            # layer 0 folds the concat([x, x]) duplication; kernel input is x_aug.
            c1 = jnp.concatenate([w1t[:, :cin] + w1t[:, cin:2 * cin], bcol(b1)], axis=1)
        else:
            # kernel conv1 input is cat([node (2gf), x_aug (cin+1)]).
            c1 = jnp.concatenate([w1t[:, cin:cin + 2 * gf], w1t[:, :cin], bcol(b1)], axis=1)
        c2 = jnp.concatenate([w2t, bcol(b2)], axis=1)          # input cat([c0, c1mix, ones])
        return [c1, c2]

    def gamma_pieces(i):
        w1, b1, w2, b2 = gammas[i]
        w1t, w2t = wt(w1), wt(w2)
        if i == 0:
            # kernel conv1 input is cat([agg (2pf), x_aug (cin+1)]).
            c1 = jnp.concatenate([w1t[:, cin:cin + 2 * pf], w1t[:, :cin], bcol(b1)], axis=1)
        else:
            # kernel conv1 input is cat([node (2gf), agg (2pf), ones]).
            c1 = jnp.concatenate([w1t, bcol(b1)], axis=1)
        c2 = jnp.concatenate([w2t, bcol(b2)], axis=1)
        return [c1, c2]

    # Consumption order must match the kernel's take() order.
    order = phi_pieces(0) + gamma_pieces(0)
    for i in range(1, 5):
        order += phi_pieces(i) + gamma_pieces(i)

    slab_cols, slab_rows, slab_parts, meta = [], [], [], []
    for p in order:
        k = p.shape[1]
        if k in slab_cols:
            si = slab_cols.index(k)
        else:
            si = len(slab_cols)
            slab_cols.append(k)
            slab_rows.append(0)
            slab_parts.append([])
        meta.append((si, slab_rows[si], p.shape[0]))
        slab_parts[si].append(p)
        slab_rows[si] += p.shape[0]

    slabs = [jnp.concatenate(ps, axis=0).astype(mm_dtype) for ps in slab_parts]
    return slabs, tuple(meta)


def gnn_forward(channel_gains_nchw, temp, weights, cfg, matmul_dtype=jnp.bfloat16):
    """channel_gains_nchw: [B, input_feature_dim, num_users, num_aps] (PyTorch NCHW)."""
    B, cin, U, A = channel_gains_nchw.shape
    assert cin == cfg["input_feature_dim"]
    assert U == cfg["num_users"] and A == cfg["num_aps"]
    assert U > 1 and A > 1, "mixing matrices divide by (U-1)/(A-1)"
    assert cfg.get("reduced_msg_input", True), "only reduced_msg_input=True supported"
    pf, gf = cfg["phi_feature_dim"], cfg["gamma_feature_dim"]
    assert pf % 8 == 0 and gf % 8 == 0, \
        "phi/gamma feature dims must be multiples of 8 (f32 sublane-aligned splits)"
    mc = cfg["max_conns_ap"]

    bb, pad = _pick_batch_block(B, U, A)
    Bp = B + pad
    G = Bp // bb
    N = bb * U * A
    mix_bb = _pick_mix_block(bb, U, A)
    MIX = mix_bb * U * A

    # NCHW -> [grid, channels, bb*U*A]: channels on sublanes, flattened
    # (local batch, user, ap) on the lane axis; append a ones row (folded biases).
    x = jnp.asarray(channel_gains_nchw, jnp.float32)
    if pad:
        x = jnp.concatenate([x, jnp.zeros((pad, cin, U, A), jnp.float32)], axis=0)
    x = x.reshape(G, bb, cin, U * A).transpose(0, 2, 1, 3).reshape(G, cin, N)
    x_aug = jnp.concatenate([x, jnp.ones((G, 1, N), jnp.float32)], axis=1)

    mu, ma, gs = _lane_constants(mix_bb, U, A, matmul_dtype)
    slabs, piece_meta = _prepare_params(weights, cfg, matmul_dtype)

    cfg_k = dict(cfg, lanes=N, mix_lanes=MIX, pieces=piece_meta,
                 matmul_dtype=matmul_dtype)

    # tau clamp + reciprocal hoisted to the wrapper; passed as a true SMEM scalar.
    inv_tau = (1.0 / jnp.maximum(jnp.asarray(temp, jnp.float32), 1e-3)).reshape(1, 1)

    def const2d(arr):
        return pl.BlockSpec(arr.shape, lambda g: (0, 0))

    in_specs = ([pl.BlockSpec(memory_space=pltpu.MemorySpace.SMEM),       # inv_tau
                 pl.BlockSpec((None, cin + 1, N), lambda g: (g, 0, 0)),   # x_aug block
                 const2d(mu), const2d(ma), const2d(gs)]
                + [const2d(s) for s in slabs])
    out_specs = pl.BlockSpec((None, 2 * mc, N), lambda g: (g, 0, 0))
    out_shape = jax.ShapeDtypeStruct((G, 2 * mc, N), jnp.float32)

    fused = pl.pallas_call(
        functools.partial(gnn_kernel, cfg=cfg_k),
        grid=(G,),
        in_specs=in_specs,
        out_specs=out_specs,
        out_shape=out_shape,
        compiler_params=pltpu.CompilerParams(
            dimension_semantics=("parallel",)),
    )(inv_tau, x_aug, mu, ma, gs, *slabs)

    # [G, 2*mc, bb*U*A] -> two NCHW [B, mc, U, A] tensors (layout plumbing in XLA).
    def to_nchw(y):
        y = y.reshape(G, mc, bb, U, A).transpose(0, 2, 1, 3, 4).reshape(Bp, mc, U, A)
        return y[:B]

    return to_nchw(fused[:, :mc, :]), to_nchw(fused[:, mc:, :])


def _linear_init(key, cin, cout):
    # deterministic, Conv2d-like uniform(-1/sqrt(fan_in), 1/sqrt(fan_in))
    k1, k2 = jax.random.split(key)
    bound = 1.0 / (cin ** 0.5)
    w = jax.random.uniform(k1, (cin, cout), jnp.float32, -bound, bound)
    b = jax.random.uniform(k2, (1, cout), jnp.float32, -bound, bound)
    return w, b


def init_weights(key, cfg):
    cin = cfg["input_feature_dim"]
    pf2 = 2 * cfg["phi_feature_dim"]
    gf2 = 2 * cfg["gamma_feature_dim"]
    # reduced_msg_input = True
    phi_in_init = 2 * cin
    phi_in = gf2 + cin
    gamma_in_init = cin + pf2
    gamma_in = gf2 + pf2

    layer_dims = (
        [(phi_in_init, pf2, pf2)] + [(phi_in, pf2, pf2)] * 4 +            # phi1..5
        [(gamma_in_init, gf2, gf2)] + [(gamma_in, gf2, gf2)] * 3 +        # gamma1..4
        [(gamma_in, gf2, cfg["max_conns_ap"])]                            # gamma5
    )
    keys = jax.random.split(key, 2 * len(layer_dims))
    weights = []
    for i, (din, dhid, dout) in enumerate(layer_dims):
        w1, b1 = _linear_init(keys[2 * i], din, dhid)
        w2, b2 = _linear_init(keys[2 * i + 1], dhid, dout)
        weights += [w1, b1, w2, b2]
    return weights   # flat list of 40 arrays (w: [cin, cout], b: [1, cout])


if __name__ == "__main__":
    cfg = dict(num_users=8, num_aps=8, input_feature_dim=4,
               phi_feature_dim=8, gamma_feature_dim=8,
               max_conns_ap=4, reduced_msg_input=True)
    B = 2

    key = jax.random.PRNGKey(0)
    kx, kw = jax.random.split(key)
    channel_gains = jax.random.normal(
        kx, (B, cfg["input_feature_dim"], cfg["num_users"], cfg["num_aps"]),
        dtype=jnp.float32)
    weights = init_weights(kw, cfg)
    temp = 1.0

    r, assignment = gnn_forward(channel_gains, temp, weights, cfg)
    jax.block_until_ready((r, assignment))

    expected = (B, cfg["max_conns_ap"], cfg["num_users"], cfg["num_aps"])
    assert r.shape == expected, r.shape
    assert assignment.shape == expected, assignment.shape
    assert bool(jnp.all(jnp.isfinite(r)))
    assert bool(jnp.all(jnp.isfinite(assignment)))
    # softmax over the users axis (dim=-2 in NCHW) must normalize to ~1
    # (denominator is computed exactly in f32 inside the kernel).
    assert bool(jnp.allclose(assignment.sum(axis=2), 1.0, atol=1e-3))
    print("KERNEL_OK")
</pallas_src>

<mosaic_0001>
module attributes {stable_mosaic.version = 11 : i64} {
  func.func @gnn_kernel(%arg0: i32, %arg1: memref<1x1xf32, #tpu.memory_space<smem>>, %arg2: memref<1x5x128xf32, #tpu.memory_space<vmem>>, %arg3: memref<128x128xbf16, #tpu.memory_space<vmem>>, %arg4: memref<128x128xbf16, #tpu.memory_space<vmem>>, %arg5: memref<128x128xf32, #tpu.memory_space<vmem>>, %arg6: memref<16x5xbf16, #tpu.memory_space<vmem>>, %arg7: memref<148x17xbf16, #tpu.memory_space<vmem>>, %arg8: memref<80x21xbf16, #tpu.memory_space<vmem>>, %arg9: memref<64x33xbf16, #tpu.memory_space<vmem>>, %arg10: memref<1x8x128xf32, #tpu.memory_space<vmem>>) attributes {dimension_semantics = [#tpu.dimension_semantics<parallel>], iteration_bounds = array<i64: 1>, scalar_prefetch = 0 : i64, scratch_operands = 0 : i64, tpu.core_type = #tpu.core_type<tc>, window_params = [{transform_indices = @transform_0, window_bounds = array<i64: 1, 1>}, {transform_indices = @transform_1, window_bounds = array<i64: 1, 5, 128>}, {pipeline_mode = #tpu.pipeline_mode<synchronous>, transform_indices = @transform_2, window_bounds = array<i64: 128, 128>}, {pipeline_mode = #tpu.pipeline_mode<synchronous>, transform_indices = @transform_3, window_bounds = array<i64: 128, 128>}, {pipeline_mode = #tpu.pipeline_mode<synchronous>, transform_indices = @transform_4, window_bounds = array<i64: 128, 128>}, {pipeline_mode = #tpu.pipeline_mode<synchronous>, transform_indices = @transform_5, window_bounds = array<i64: 16, 5>}, {pipeline_mode = #tpu.pipeline_mode<synchronous>, transform_indices = @transform_6, window_bounds = array<i64: 148, 17>}, {pipeline_mode = #tpu.pipeline_mode<synchronous>, transform_indices = @transform_7, window_bounds = array<i64: 80, 21>}, {pipeline_mode = #tpu.pipeline_mode<synchronous>, transform_indices = @transform_8, window_bounds = array<i64: 64, 33>}, {transform_indices = @transform_9, window_bounds = array<i64: 1, 8, 128>}]} {
    %c0 = arith.constant 0 : index
    %c0_0 = arith.constant 0 : index
    %c0_1 = arith.constant 0 : index
    %0 = vector.load %arg2[%c0, %c0_0, %c0_1] : memref<1x5x128xf32, #tpu.memory_space<vmem>>, vector<1x5x128xf32>
    %1 = vector.shape_cast %0 : vector<1x5x128xf32> to vector<5x128xf32>
    %cst = arith.constant 1.000000e+00 : f32
    %2 = vector.broadcast %cst : f32 to vector<1x128xf32>
    %c0_2 = arith.constant 0 : index
    %c0_3 = arith.constant 0 : index
    %3 = vector.load %arg6[%c0_2, %c0_3] : memref<16x5xbf16, #tpu.memory_space<vmem>>, vector<16x5xbf16>
    %4 = arith.truncf %1 : vector<5x128xf32> to vector<5x128xbf16>
    %cst_4 = arith.constant dense<0.000000e+00> : vector<16x128xf32>
    %5 = tpu.matmul %3, %4, %cst_4 {dimension_numbers = #tpu.dot_dimension_numbers<[1], [0], [0], [1], [0, 0, 1, 1], [], []>} : vector<16x5xbf16>, vector<5x128xbf16>, vector<16x128xf32> -> vector<16x128xf32>
    %cst_5 = arith.constant 0.000000e+00 : f32
    %6 = vector.broadcast %cst_5 : f32 to vector<16x128xf32>
    %7 = arith.maximumf %5, %6 : vector<16x128xf32>
    %8 = vector.extract_strided_slice %7 {offsets = [0, 0], sizes = [8, 128], strides = [1, 1]} : vector<16x128xf32> to vector<8x128xf32>
    %9 = vector.extract_strided_slice %7 {offsets = [8, 0], sizes = [8, 128], strides = [1, 1]} : vector<16x128xf32> to vector<8x128xf32>
    %c0_6 = arith.constant 0 : index
    %c0_7 = arith.constant 0 : index
    %10 = vector.load %arg3[%c0_6, %c0_7] : memref<128x128xbf16, #tpu.memory_space<vmem>>, vector<128x128xbf16>
    %11 = arith.truncf %9 : vector<8x128xf32> to vector<8x128xbf16>
    %cst_8 = arith.constant dense<0.000000e+00> : vector<8x128xf32>
    %12 = tpu.matmul %11, %10, %cst_8 {dimension_numbers = #tpu.dot_dimension_numbers<[1], [0], [0], [1], [0, 0, 1, 1], [], []>} : vector<8x128xbf16>, vector<128x128xbf16>, vector<8x128xf32> -> vector<8x128xf32>
    %13 = tpu.concatenate %8, %12, %2 in 0 : vector<8x128xf32>, vector<8x128xf32>, vector<1x128xf32> -> vector<17x128xf32>
    %c0_9 = arith.constant 0 : index
    %c0_10 = arith.constant 0 : index
    %14 = vector.load %arg7[%c0_9, %c0_10] : memref<148x17xbf16, #tpu.memory_space<vmem>>, vector<16x17xbf16>
    %15 = arith.truncf %13 : vector<17x128xf32> to vector<17x128xbf16>
    %cst_11 = arith.constant dense<0.000000e+00> : vector<16x128xf32>
    %16 = tpu.matmul %14, %15, %cst_11 {dimension_numbers = #tpu.dot_dimension_numbers<[1], [0], [0], [1], [0, 0, 1, 1], [], []>} : vector<16x17xbf16>, vector<17x128xbf16>, vector<16x128xf32> -> vector<16x128xf32>
    %17 = vector.extract_strided_slice %16 {offsets = [0, 0], sizes = [8, 128], strides = [1, 1]} : vector<16x128xf32> to vector<8x128xf32>
    %18 = vector.extract_strided_slice %16 {offsets = [8, 0], sizes = [8, 128], strides = [1, 1]} : vector<16x128xf32> to vector<8x128xf32>
    %c0_12 = arith.constant 0 : index
    %c0_13 = arith.constant 0 : index
    %19 = vector.load %arg3[%c0_12, %c0_13] : memref<128x128xbf16, #tpu.memory_space<vmem>>, vector<128x128xbf16>
    %20 = arith.truncf %18 : vector<8x128xf32> to vector<8x128xbf16>
    %cst_14 = arith.constant dense<0.000000e+00> : vector<8x128xf32>
    %21 = tpu.matmul %20, %19, %cst_14 {dimension_numbers = #tpu.dot_dimension_numbers<[1], [0], [0], [1], [0, 0, 1, 1], [], []>} : vector<8x128xbf16>, vector<128x128xbf16>, vector<8x128xf32> -> vector<8x128xf32>
    %22 = tpu.concatenate %17, %21 in 0 : vector<8x128xf32>, vector<8x128xf32> -> vector<16x128xf32>
    %c0_15 = arith.constant 0 : index
    %c0_16 = arith.constant 0 : index
    %23 = vector.load %arg4[%c0_15, %c0_16] : memref<128x128xbf16, #tpu.memory_space<vmem>>, vector<128x128xbf16>
    %24 = arith.truncf %22 : vector<16x128xf32> to vector<16x128xbf16>
    %cst_17 = arith.constant dense<0.000000e+00> : vector<16x128xf32>
    %25 = tpu.matmul %24, %23, %cst_17 {dimension_numbers = #tpu.dot_dimension_numbers<[1], [0], [0], [1], [0, 0, 1, 1], [], []>} : vector<16x128xbf16>, vector<128x128xbf16>, vector<16x128xf32> -> vector<16x128xf32>
    %26 = tpu.concatenate %25, %1 in 0 : vector<16x128xf32>, vector<5x128xf32> -> vector<21x128xf32>
    %c0_18 = arith.constant 0 : index
    %c0_19 = arith.constant 0 : index
    %27 = vector.load %arg8[%c0_18, %c0_19] : memref<80x21xbf16, #tpu.memory_space<vmem>>, vector<16x21xbf16>
    %28 = arith.truncf %26 : vector<21x128xf32> to vector<21x128xbf16>
    %cst_20 = arith.constant dense<0.000000e+00> : vector<16x128xf32>
    %29 = tpu.matmul %27, %28, %cst_20 {dimension_numbers = #tpu.dot_dimension_numbers<[1], [0], [0], [1], [0, 0, 1, 1], [], []>} : vector<16x21xbf16>, vector<21x128xbf16>, vector<16x128xf32> -> vector<16x128xf32>
    %cst_21 = arith.constant 0.000000e+00 : f32
    %30 = vector.broadcast %cst_21 : f32 to vector<16x128xf32>
    %31 = arith.maximumf %29, %30 : vector<16x128xf32>
    %32 = vector.extract_strided_slice %31 {offsets = [0, 0], sizes = [8, 128], strides = [1, 1]} : vector<16x128xf32> to vector<8x128xf32>
    %33 = vector.extract_strided_slice %31 {offsets = [8, 0], sizes = [8, 128], strides = [1, 1]} : vector<16x128xf32> to vector<8x128xf32>
    %c0_22 = arith.constant 0 : index
    %c0_23 = arith.constant 0 : index
    %34 = vector.load %arg3[%c0_22, %c0_23] : memref<128x128xbf16, #tpu.memory_space<vmem>>, vector<128x128xbf16>
    %35 = arith.truncf %33 : vector<8x128xf32> to vector<8x128xbf16>
    %cst_24 = arith.constant dense<0.000000e+00> : vector<8x128xf32>
    %36 = tpu.matmul %35, %34, %cst_24 {dimension_numbers = #tpu.dot_dimension_numbers<[1], [0], [0], [1], [0, 0, 1, 1], [], []>} : vector<8x128xbf16>, vector<128x128xbf16>, vector<8x128xf32> -> vector<8x128xf32>
    %37 = tpu.concatenate %32, %36, %2 in 0 : vector<8x128xf32>, vector<8x128xf32>, vector<1x128xf32> -> vector<17x128xf32>
    %c16 = arith.constant 16 : index
    %c0_25 = arith.constant 0 : index
    %38 = vector.load %arg7[%c16, %c0_25] : memref<148x17xbf16, #tpu.memory_space<vmem>>, vector<16x17xbf16>
    %39 = arith.truncf %37 : vector<17x128xf32> to vector<17x128xbf16>
    %cst_26 = arith.constant dense<0.000000e+00> : vector<16x128xf32>
    %40 = tpu.matmul %38, %39, %cst_26 {dimension_numbers = #tpu.dot_dimension_numbers<[1], [0], [0], [1], [0, 0, 1, 1], [], []>} : vector<16x17xbf16>, vector<17x128xbf16>, vector<16x128xf32> -> vector<16x128xf32>
    %cst_27 = arith.constant 0.000000e+00 : f32
    %41 = vector.broadcast %cst_27 : f32 to vector<16x128xf32>
    %42 = arith.maximumf %40, %41 : vector<16x128xf32>
    %43 = vector.extract_strided_slice %42 {offsets = [0, 0], sizes = [8, 128], strides = [1, 1]} : vector<16x128xf32> to vector<8x128xf32>
    %44 = vector.extract_strided_slice %42 {offsets = [8, 0], sizes = [8, 128], strides = [1, 1]} : vector<16x128xf32> to vector<8x128xf32>
    %c0_28 = arith.constant 0 : index
    %c0_29 = arith.constant 0 : index
    %45 = vector.load %arg3[%c0_28, %c0_29] : memref<128x128xbf16, #tpu.memory_space<vmem>>, vector<128x128xbf16>
    %46 = arith.truncf %44 : vector<8x128xf32> to vector<8x128xbf16>
    %cst_30 = arith.constant dense<0.000000e+00> : vector<8x128xf32>
    %47 = tpu.matmul %46, %45, %cst_30 {dimension_numbers = #tpu.dot_dimension_numbers<[1], [0], [0], [1], [0, 0, 1, 1], [], []>} : vector<8x128xbf16>, vector<128x128xbf16>, vector<8x128xf32> -> vector<8x128xf32>
    %48 = tpu.concatenate %43, %47 in 0 : vector<8x128xf32>, vector<8x128xf32> -> vector<16x128xf32>
    %49 = tpu.concatenate %48, %1 in 0 : vector<16x128xf32>, vector<5x128xf32> -> vector<21x128xf32>
    %c16_31 = arith.constant 16 : index
    %c0_32 = arith.constant 0 : index
    %50 = vector.load %arg8[%c16_31, %c0_32] : memref<80x21xbf16, #tpu.memory_space<vmem>>, vector<16x21xbf16>
    %51 = arith.truncf %49 : vector<21x128xf32> to vector<21x128xbf16>
    %cst_33 = arith.constant dense<0.000000e+00> : vector<16x128xf32>
    %52 = tpu.matmul %50, %51, %cst_33 {dimension_numbers = #tpu.dot_dimension_numbers<[1], [0], [0], [1], [0, 0, 1, 1], [], []>} : vector<16x21xbf16>, vector<21x128xbf16>, vector<16x128xf32> -> vector<16x128xf32>
    %cst_34 = arith.constant 0.000000e+00 : f32
    %53 = vector.broadcast %cst_34 : f32 to vector<16x128xf32>
    %54 = arith.maximumf %52, %53 : vector<16x128xf32>
    %55 = vector.extract_strided_slice %54 {offsets = [0, 0], sizes = [8, 128], strides = [1, 1]} : vector<16x128xf32> to vector<8x128xf32>
    %56 = vector.extract_strided_slice %54 {offsets = [8, 0], sizes = [8, 128], strides = [1, 1]} : vector<16x128xf32> to vector<8x128xf32>
    %c0_35 = arith.constant 0 : index
    %c0_36 = arith.constant 0 : index
    %57 = vector.load %arg3[%c0_35, %c0_36] : memref<128x128xbf16, #tpu.memory_space<vmem>>, vector<128x128xbf16>
    %58 = arith.truncf %56 : vector<8x128xf32> to vector<8x128xbf16>
    %cst_37 = arith.constant dense<0.000000e+00> : vector<8x128xf32>
    %59 = tpu.matmul %58, %57, %cst_37 {dimension_numbers = #tpu.dot_dimension_numbers<[1], [0], [0], [1], [0, 0, 1, 1], [], []>} : vector<8x128xbf16>, vector<128x128xbf16>, vector<8x128xf32> -> vector<8x128xf32>
    %60 = tpu.concatenate %55, %59, %2 in 0 : vector<8x128xf32>, vector<8x128xf32>, vector<1x128xf32> -> vector<17x128xf32>
    %c32 = arith.constant 32 : index
    %c0_38 = arith.constant 0 : index
    %61 = vector.load %arg7[%c32, %c0_38] : memref<148x17xbf16, #tpu.memory_space<vmem>>, vector<16x17xbf16>
    %62 = arith.truncf %60 : vector<17x128xf32> to vector<17x128xbf16>
    %cst_39 = arith.constant dense<0.000000e+00> : vector<16x128xf32>
    %63 = tpu.matmul %61, %62, %cst_39 {dimension_numbers = #tpu.dot_dimension_numbers<[1], [0], [0], [1], [0, 0, 1, 1], [], []>} : vector<16x17xbf16>, vector<17x128xbf16>, vector<16x128xf32> -> vector<16x128xf32>
    %64 = vector.extract_strided_slice %63 {offsets = [0, 0], sizes = [8, 128], strides = [1, 1]} : vector<16x128xf32> to vector<8x128xf32>
    %65 = vector.extract_strided_slice %63 {offsets = [8, 0], sizes = [8, 128], strides = [1, 1]} : vector<16x128xf32> to vector<8x128xf32>
    %c0_40 = arith.constant 0 : index
    %c0_41 = arith.constant 0 : index
    %66 = vector.load %arg3[%c0_40, %c0_41] : memref<128x128xbf16, #tpu.memory_space<vmem>>, vector<128x128xbf16>
    %67 = arith.truncf %65 : vector<8x128xf32> to vector<8x128xbf16>
    %cst_42 = arith.constant dense<0.000000e+00> : vector<8x128xf32>
    %68 = tpu.matmul %67, %66, %cst_42 {dimension_numbers = #tpu.dot_dimension_numbers<[1], [0], [0], [1], [0, 0, 1, 1], [], []>} : vector<8x128xbf16>, vector<128x128xbf16>, vector<8x128xf32> -> vector<8x128xf32>
    %69 = tpu.concatenate %64, %68 in 0 : vector<8x128xf32>, vector<8x128xf32> -> vector<16x128xf32>
    %c0_43 = arith.constant 0 : index
    %c0_44 = arith.constant 0 : index
    %70 = vector.load %arg4[%c0_43, %c0_44] : memref<128x128xbf16, #tpu.memory_space<vmem>>, vector<128x128xbf16>
    %71 = arith.truncf %69 : vector<16x128xf32> to vector<16x128xbf16>
    %cst_45 = arith.constant dense<0.000000e+00> : vector<16x128xf32>
    %72 = tpu.matmul %71, %70, %cst_45 {dimension_numbers = #tpu.dot_dimension_numbers<[1], [0], [0], [1], [0, 0, 1, 1], [], []>} : vector<16x128xbf16>, vector<128x128xbf16>, vector<16x128xf32> -> vector<16x128xf32>
    %73 = tpu.concatenate %48, %72, %2 in 0 : vector<16x128xf32>, vector<16x128xf32>, vector<1x128xf32> -> vector<33x128xf32>
    %c0_46 = arith.constant 0 : index
    %c0_47 = arith.constant 0 : index
    %74 = vector.load %arg9[%c0_46, %c0_47] : memref<64x33xbf16, #tpu.memory_space<vmem>>, vector<16x33xbf16>
    %75 = arith.truncf %73 : vector<33x128xf32> to vector<33x128xbf16>
    %cst_48 = arith.constant dense<0.000000e+00> : vector<16x128xf32>
    %76 = tpu.matmul %74, %75, %cst_48 {dimension_numbers = #tpu.dot_dimension_numbers<[1], [0], [0], [1], [0, 0, 1, 1], [], []>} : vector<16x33xbf16>, vector<33x128xbf16>, vector<16x128xf32> -> vector<16x128xf32>
    %cst_49 = arith.constant 0.000000e+00 : f32
    %77 = vector.broadcast %cst_49 : f32 to vector<16x128xf32>
    %78 = arith.maximumf %76, %77 : vector<16x128xf32>
    %79 = vector.extract_strided_slice %78 {offsets = [0, 0], sizes = [8, 128], strides = [1, 1]} : vector<16x128xf32> to vector<8x128xf32>
    %80 = vector.extract_strided_slice %78 {offsets = [8, 0], sizes = [8, 128], strides = [1, 1]} : vector<16x128xf32> to vector<8x128xf32>
    %c0_50 = arith.constant 0 : index
    %c0_51 = arith.constant 0 : index
    %81 = vector.load %arg3[%c0_50, %c0_51] : memref<128x128xbf16, #tpu.memory_space<vmem>>, vector<128x128xbf16>
    %82 = arith.truncf %80 : vector<8x128xf32> to vector<8x128xbf16>
    %cst_52 = arith.constant dense<0.000000e+00> : vector<8x128xf32>
    %83 = tpu.matmul %82, %81, %cst_52 {dimension_numbers = #tpu.dot_dimension_numbers<[1], [0], [0], [1], [0, 0, 1, 1], [], []>} : vector<8x128xbf16>, vector<128x128xbf16>, vector<8x128xf32> -> vector<8x128xf32>
    %84 = tpu.concatenate %79, %83, %2 in 0 : vector<8x128xf32>, vector<8x128xf32>, vector<1x128xf32> -> vector<17x128xf32>
    %c48 = arith.constant 48 : index
    %c0_53 = arith.constant 0 : index
    %85 = vector.load %arg7[%c48, %c0_53] : memref<148x17xbf16, #tpu.memory_space<vmem>>, vector<16x17xbf16>
    %86 = arith.truncf %84 : vector<17x128xf32> to vector<17x128xbf16>
    %cst_54 = arith.constant dense<0.000000e+00> : vector<16x128xf32>
    %87 = tpu.matmul %85, %86, %cst_54 {dimension_numbers = #tpu.dot_dimension_numbers<[1], [0], [0], [1], [0, 0, 1, 1], [], []>} : vector<16x17xbf16>, vector<17x128xbf16>, vector<16x128xf32> -> vector<16x128xf32>
    %cst_55 = arith.constant 0.000000e+00 : f32
    %88 = vector.broadcast %cst_55 : f32 to vector<16x128xf32>
    %89 = arith.maximumf %87, %88 : vector<16x128xf32>
    %90 = vector.extract_strided_slice %89 {offsets = [0, 0], sizes = [8, 128], strides = [1, 1]} : vector<16x128xf32> to vector<8x128xf32>
    %91 = vector.extract_strided_slice %89 {offsets = [8, 0], sizes = [8, 128], strides = [1, 1]} : vector<16x128xf32> to vector<8x128xf32>
    %c0_56 = arith.constant 0 : index
    %c0_57 = arith.constant 0 : index
    %92 = vector.load %arg3[%c0_56, %c0_57] : memref<128x128xbf16, #tpu.memory_space<vmem>>, vector<128x128xbf16>
    %93 = arith.truncf %91 : vector<8x128xf32> to vector<8x128xbf16>
    %cst_58 = arith.constant dense<0.000000e+00> : vector<8x128xf32>
    %94 = tpu.matmul %93, %92, %cst_58 {dimension_numbers = #tpu.dot_dimension_numbers<[1], [0], [0], [1], [0, 0, 1, 1], [], []>} : vector<8x128xbf16>, vector<128x128xbf16>, vector<8x128xf32> -> vector<8x128xf32>
    %95 = tpu.concatenate %90, %94 in 0 : vector<8x128xf32>, vector<8x128xf32> -> vector<16x128xf32>
    %96 = tpu.concatenate %95, %1 in 0 : vector<16x128xf32>, vector<5x128xf32> -> vector<21x128xf32>
    %c32_59 = arith.constant 32 : index
    %c0_60 = arith.constant 0 : index
    %97 = vector.load %arg8[%c32_59, %c0_60] : memref<80x21xbf16, #tpu.memory_space<vmem>>, vector<16x21xbf16>
    %98 = arith.truncf %96 : vector<21x128xf32> to vector<21x128xbf16>
    %cst_61 = arith.constant dense<0.000000e+00> : vector<16x128xf32>
    %99 = tpu.matmul %97, %98, %cst_61 {dimension_numbers = #tpu.dot_dimension_numbers<[1], [0], [0], [1], [0, 0, 1, 1], [], []>} : vector<16x21xbf16>, vector<21x128xbf16>, vector<16x128xf32> -> vector<16x128xf32>
    %cst_62 = arith.constant 0.000000e+00 : f32
    %100 = vector.broadcast %cst_62 : f32 to vector<16x128xf32>
    %101 = arith.maximumf %99, %100 : vector<16x128xf32>
    %102 = vector.extract_strided_slice %101 {offsets = [0, 0], sizes = [8, 128], strides = [1, 1]} : vector<16x128xf32> to vector<8x128xf32>
    %103 = vector.extract_strided_slice %101 {offsets = [8, 0], sizes = [8, 128], strides = [1, 1]} : vector<16x128xf32> to vector<8x128xf32>
    %c0_63 = arith.constant 0 : index
    %c0_64 = arith.constant 0 : index
    %104 = vector.load %arg3[%c0_63, %c0_64] : memref<128x128xbf16, #tpu.memory_space<vmem>>, vector<128x128xbf16>
    %105 = arith.truncf %103 : vector<8x128xf32> to vector<8x128xbf16>
    %cst_65 = arith.constant dense<0.000000e+00> : vector<8x128xf32>
    %106 = tpu.matmul %105, %104, %cst_65 {dimension_numbers = #tpu.dot_dimension_numbers<[1], [0], [0], [1], [0, 0, 1, 1], [], []>} : vector<8x128xbf16>, vector<128x128xbf16>, vector<8x128xf32> -> vector<8x128xf32>
    %107 = tpu.concatenate %102, %106, %2 in 0 : vector<8x128xf32>, vector<8x128xf32>, vector<1x128xf32> -> vector<17x128xf32>
    %c64 = arith.constant 64 : index
    %c0_66 = arith.constant 0 : index
    %108 = vector.load %arg7[%c64, %c0_66] : memref<148x17xbf16, #tpu.memory_space<vmem>>, vector<16x17xbf16>
    %109 = arith.truncf %107 : vector<17x128xf32> to vector<17x128xbf16>
    %cst_67 = arith.constant dense<0.000000e+00> : vector<16x128xf32>
    %110 = tpu.matmul %108, %109, %cst_67 {dimension_numbers = #tpu.dot_dimension_numbers<[1], [0], [0], [1], [0, 0, 1, 1], [], []>} : vector<16x17xbf16>, vector<17x128xbf16>, vector<16x128xf32> -> vector<16x128xf32>
    %111 = vector.extract_strided_slice %110 {offsets = [0, 0], sizes = [8, 128], strides = [1, 1]} : vector<16x128xf32> to vector<8x128xf32>
    %112 = vector.extract_strided_slice %110 {offsets = [8, 0], sizes = [8, 128], strides = [1, 1]} : vector<16x128xf32> to vector<8x128xf32>
    %c0_68 = arith.constant 0 : index
    %c0_69 = arith.constant 0 : index
    %113 = vector.load %arg3[%c0_68, %c0_69] : memref<128x128xbf16, #tpu.memory_space<vmem>>, vector<128x128xbf16>
    %114 = arith.truncf %112 : vector<8x128xf32> to vector<8x128xbf16>
    %cst_70 = arith.constant dense<0.000000e+00> : vector<8x128xf32>
    %115 = tpu.matmul %114, %113, %cst_70 {dimension_numbers = #tpu.dot_dimension_numbers<[1], [0], [0], [1], [0, 0, 1, 1], [], []>} : vector<8x128xbf16>, vector<128x128xbf16>, vector<8x128xf32> -> vector<8x128xf32>
    %116 = tpu.concatenate %111, %115 in 0 : vector<8x128xf32>, vector<8x128xf32> -> vector<16x128xf32>
    %c0_71 = arith.constant 0 : index
    %c0_72 = arith.constant 0 : index
    %117 = vector.load %arg4[%c0_71, %c0_72] : memref<128x128xbf16, #tpu.memory_space<vmem>>, vector<128x128xbf16>
    %118 = arith.truncf %116 : vector<16x128xf32> to vector<16x128xbf16>
    %cst_73 = arith.constant dense<0.000000e+00> : vector<16x128xf32>
    %119 = tpu.matmul %118, %117, %cst_73 {dimension_numbers = #tpu.dot_dimension_numbers<[1], [0], [0], [1], [0, 0, 1, 1], [], []>} : vector<16x128xbf16>, vector<128x128xbf16>, vector<16x128xf32> -> vector<16x128xf32>
    %120 = tpu.concatenate %95, %119, %2 in 0 : vector<16x128xf32>, vector<16x128xf32>, vector<1x128xf32> -> vector<33x128xf32>
    %c16_74 = arith.constant 16 : index
    %c0_75 = arith.constant 0 : index
    %121 = vector.load %arg9[%c16_74, %c0_75] : memref<64x33xbf16, #tpu.memory_space<vmem>>, vector<16x33xbf16>
    %122 = arith.truncf %120 : vector<33x128xf32> to vector<33x128xbf16>
    %cst_76 = arith.constant dense<0.000000e+00> : vector<16x128xf32>
    %123 = tpu.matmul %121, %122, %cst_76 {dimension_numbers = #tpu.dot_dimension_numbers<[1], [0], [0], [1], [0, 0, 1, 1], [], []>} : vector<16x33xbf16>, vector<33x128xbf16>, vector<16x128xf32> -> vector<16x128xf32>
    %cst_77 = arith.constant 0.000000e+00 : f32
    %124 = vector.broadcast %cst_77 : f32 to vector<16x128xf32>
    %125 = arith.maximumf %123, %124 : vector<16x128xf32>
    %126 = vector.extract_strided_slice %125 {offsets = [0, 0], sizes = [8, 128], strides = [1, 1]} : vector<16x128xf32> to vector<8x128xf32>
    %127 = vector.extract_strided_slice %125 {offsets = [8, 0], sizes = [8, 128], strides = [1, 1]} : vector<16x128xf32> to vector<8x128xf32>
    %c0_78 = arith.constant 0 : index
    %c0_79 = arith.constant 0 : index
    %128 = vector.load %arg3[%c0_78, %c0_79] : memref<128x128xbf16, #tpu.memory_space<vmem>>, vector<128x128xbf16>
    %129 = arith.truncf %127 : vector<8x128xf32> to vector<8x128xbf16>
    %cst_80 = arith.constant dense<0.000000e+00> : vector<8x128xf32>
    %130 = tpu.matmul %129, %128, %cst_80 {dimension_numbers = #tpu.dot_dimension_numbers<[1], [0], [0], [1], [0, 0, 1, 1], [], []>} : vector<8x128xbf16>, vector<128x128xbf16>, vector<8x128xf32> -> vector<8x128xf32>
    %131 = tpu.concatenate %126, %130, %2 in 0 : vector<8x128xf32>, vector<8x128xf32>, vector<1x128xf32> -> vector<17x128xf32>
    %c80 = arith.constant 80 : index
    %c0_81 = arith.constant 0 : index
    %132 = vector.load %arg7[%c80, %c0_81] : memref<148x17xbf16, #tpu.memory_space<vmem>>, vector<16x17xbf16>
    %133 = arith.truncf %131 : vector<17x128xf32> to vector<17x128xbf16>
    %cst_82 = arith.constant dense<0.000000e+00> : vector<16x128xf32>
    %134 = tpu.matmul %132, %133, %cst_82 {dimension_numbers = #tpu.dot_dimension_numbers<[1], [0], [0], [1], [0, 0, 1, 1], [], []>} : vector<16x17xbf16>, vector<17x128xbf16>, vector<16x128xf32> -> vector<16x128xf32>
    %cst_83 = arith.constant 0.000000e+00 : f32
    %135 = vector.broadcast %cst_83 : f32 to vector<16x128xf32>
    %136 = arith.maximumf %134, %135 : vector<16x128xf32>
    %137 = vector.extract_strided_slice %136 {offsets = [0, 0], sizes = [8, 128], strides = [1, 1]} : vector<16x128xf32> to vector<8x128xf32>
    %138 = vector.extract_strided_slice %136 {offsets = [8, 0], sizes = [8, 128], strides = [1, 1]} : vector<16x128xf32> to vector<8x128xf32>
    %c0_84 = arith.constant 0 : index
    %c0_85 = arith.constant 0 : index
    %139 = vector.load %arg3[%c0_84, %c0_85] : memref<128x128xbf16, #tpu.memory_space<vmem>>, vector<128x128xbf16>
    %140 = arith.truncf %138 : vector<8x128xf32> to vector<8x128xbf16>
    %cst_86 = arith.constant dense<0.000000e+00> : vector<8x128xf32>
    %141 = tpu.matmul %140, %139, %cst_86 {dimension_numbers = #tpu.dot_dimension_numbers<[1], [0], [0], [1], [0, 0, 1, 1], [], []>} : vector<8x128xbf16>, vector<128x128xbf16>, vector<8x128xf32> -> vector<8x128xf32>
    %142 = tpu.concatenate %137, %141 in 0 : vector<8x128xf32>, vector<8x128xf32> -> vector<16x128xf32>
    %143 = tpu.concatenate %142, %1 in 0 : vector<16x128xf32>, vector<5x128xf32> -> vector<21x128xf32>
    %c48_87 = arith.constant 48 : index
    %c0_88 = arith.constant 0 : index
    %144 = vector.load %arg8[%c48_87, %c0_88] : memref<80x21xbf16, #tpu.memory_space<vmem>>, vector<16x21xbf16>
    %145 = arith.truncf %143 : vector<21x128xf32> to vector<21x128xbf16>
    %cst_89 = arith.constant dense<0.000000e+00> : vector<16x128xf32>
    %146 = tpu.matmul %144, %145, %cst_89 {dimension_numbers = #tpu.dot_dimension_numbers<[1], [0], [0], [1], [0, 0, 1, 1], [], []>} : vector<16x21xbf16>, vector<21x128xbf16>, vector<16x128xf32> -> vector<16x128xf32>
    %cst_90 = arith.constant 0.000000e+00 : f32
    %147 = vector.broadcast %cst_90 : f32 to vector<16x128xf32>
    %148 = arith.maximumf %146, %147 : vector<16x128xf32>
    %149 = vector.extract_strided_slice %148 {offsets = [0, 0], sizes = [8, 128], strides = [1, 1]} : vector<16x128xf32> to vector<8x128xf32>
    %150 = vector.extract_strided_slice %148 {offsets = [8, 0], sizes = [8, 128], strides = [1, 1]} : vector<16x128xf32> to vector<8x128xf32>
    %c0_91 = arith.constant 0 : index
    %c0_92 = arith.constant 0 : index
    %151 = vector.load %arg3[%c0_91, %c0_92] : memref<128x128xbf16, #tpu.memory_space<vmem>>, vector<128x128xbf16>
    %152 = arith.truncf %150 : vector<8x128xf32> to vector<8x128xbf16>
    %cst_93 = arith.constant dense<0.000000e+00> : vector<8x128xf32>
    %153 = tpu.matmul %152, %151, %cst_93 {dimension_numbers = #tpu.dot_dimension_numbers<[1], [0], [0], [1], [0, 0, 1, 1], [], []>} : vector<8x128xbf16>, vector<128x128xbf16>, vector<8x128xf32> -> vector<8x128xf32>
    %154 = tpu.concatenate %149, %153, %2 in 0 : vector<8x128xf32>, vector<8x128xf32>, vector<1x128xf32> -> vector<17x128xf32>
    %c96 = arith.constant 96 : index
    %c0_94 = arith.constant 0 : index
    %155 = vector.load %arg7[%c96, %c0_94] : memref<148x17xbf16, #tpu.memory_space<vmem>>, vector<16x17xbf16>
    %156 = arith.truncf %154 : vector<17x128xf32> to vector<17x128xbf16>
    %cst_95 = arith.constant dense<0.000000e+00> : vector<16x128xf32>
    %157 = tpu.matmul %155, %156, %cst_95 {dimension_numbers = #tpu.dot_dimension_numbers<[1], [0], [0], [1], [0, 0, 1, 1], [], []>} : vector<16x17xbf16>, vector<17x128xbf16>, vector<16x128xf32> -> vector<16x128xf32>
    %158 = vector.extract_strided_slice %157 {offsets = [0, 0], sizes = [8, 128], strides = [1, 1]} : vector<16x128xf32> to vector<8x128xf32>
    %159 = vector.extract_strided_slice %157 {offsets = [8, 0], sizes = [8, 128], strides = [1, 1]} : vector<16x128xf32> to vector<8x128xf32>
    %c0_96 = arith.constant 0 : index
    %c0_97 = arith.constant 0 : index
    %160 = vector.load %arg3[%c0_96, %c0_97] : memref<128x128xbf16, #tpu.memory_space<vmem>>, vector<128x128xbf16>
    %161 = arith.truncf %159 : vector<8x128xf32> to vector<8x128xbf16>
    %cst_98 = arith.constant dense<0.000000e+00> : vector<8x128xf32>
    %162 = tpu.matmul %161, %160, %cst_98 {dimension_numbers = #tpu.dot_dimension_numbers<[1], [0], [0], [1], [0, 0, 1, 1], [], []>} : vector<8x128xbf16>, vector<128x128xbf16>, vector<8x128xf32> -> vector<8x128xf32>
    %163 = tpu.concatenate %158, %162 in 0 : vector<8x128xf32>, vector<8x128xf32> -> vector<16x128xf32>
    %c0_99 = arith.constant 0 : index
    %c0_100 = arith.constant 0 : index
    %164 = vector.load %arg4[%c0_99, %c0_100] : memref<128x128xbf16, #tpu.memory_space<vmem>>, vector<128x128xbf16>
    %165 = arith.truncf %163 : vector<16x128xf32> to vector<16x128xbf16>
    %cst_101 = arith.constant dense<0.000000e+00> : vector<16x128xf32>
    %166 = tpu.matmul %165, %164, %cst_101 {dimension_numbers = #tpu.dot_dimension_numbers<[1], [0], [0], [1], [0, 0, 1, 1], [], []>} : vector<16x128xbf16>, vector<128x128xbf16>, vector<16x128xf32> -> vector<16x128xf32>
    %167 = tpu.concatenate %142, %166, %2 in 0 : vector<16x128xf32>, vector<16x128xf32>, vector<1x128xf32> -> vector<33x128xf32>
    %c32_102 = arith.constant 32 : index
    %c0_103 = arith.constant 0 : index
    %168 = vector.load %arg9[%c32_102, %c0_103] : memref<64x33xbf16, #tpu.memory_space<vmem>>, vector<16x33xbf16>
    %169 = arith.truncf %167 : vector<33x128xf32> to vector<33x128xbf16>
    %cst_104 = arith.constant dense<0.000000e+00> : vector<16x128xf32>
    %170 = tpu.matmul %168, %169, %cst_104 {dimension_numbers = #tpu.dot_dimension_numbers<[1], [0], [0], [1], [0, 0, 1, 1], [], []>} : vector<16x33xbf16>, vector<33x128xbf16>, vector<16x128xf32> -> vector<16x128xf32>
    %cst_105 = arith.constant 0.000000e+00 : f32
    %171 = vector.broadcast %cst_105 : f32 to vector<16x128xf32>
    %172 = arith.maximumf %170, %171 : vector<16x128xf32>
    %173 = vector.extract_strided_slice %172 {offsets = [0, 0], sizes = [8, 128], strides = [1, 1]} : vector<16x128xf32> to vector<8x128xf32>
    %174 = vector.extract_strided_slice %172 {offsets = [8, 0], sizes = [8, 128], strides = [1, 1]} : vector<16x128xf32> to vector<8x128xf32>
    %c0_106 = arith.constant 0 : index
    %c0_107 = arith.constant 0 : index
    %175 = vector.load %arg3[%c0_106, %c0_107] : memref<128x128xbf16, #tpu.memory_space<vmem>>, vector<128x128xbf16>
    %176 = arith.truncf %174 : vector<8x128xf32> to vector<8x128xbf16>
    %cst_108 = arith.constant dense<0.000000e+00> : vector<8x128xf32>
    %177 = tpu.matmul %176, %175, %cst_108 {dimension_numbers = #tpu.dot_dimension_numbers<[1], [0], [0], [1], [0, 0, 1, 1], [], []>} : vector<8x128xbf16>, vector<128x128xbf16>, vector<8x128xf32> -> vector<8x128xf32>
    %178 = tpu.concatenate %173, %177, %2 in 0 : vector<8x128xf32>, vector<8x128xf32>, vector<1x128xf32> -> vector<17x128xf32>
    %c112 = arith.constant 112 : index
    %c0_109 = arith.constant 0 : index
    %179 = vector.load %arg7[%c112, %c0_109] : memref<148x17xbf16, #tpu.memory_space<vmem>>, vector<16x17xbf16>
    %180 = arith.truncf %178 : vector<17x128xf32> to vector<17x128xbf16>
    %cst_110 = arith.constant dense<0.000000e+00> : vector<16x128xf32>
    %181 = tpu.matmul %179, %180, %cst_110 {dimension_numbers = #tpu.dot_dimension_numbers<[1], [0], [0], [1], [0, 0, 1, 1], [], []>} : vector<16x17xbf16>, vector<17x128xbf16>, vector<16x128xf32> -> vector<16x128xf32>
    %cst_111 = arith.constant 0.000000e+00 : f32
    %182 = vector.broadcast %cst_111 : f32 to vector<16x128xf32>
    %183 = arith.maximumf %181, %182 : vector<16x128xf32>
    %184 = vector.extract_strided_slice %183 {offsets = [0, 0], sizes = [8, 128], strides = [1, 1]} : vector<16x128xf32> to vector<8x128xf32>
    %185 = vector.extract_strided_slice %183 {offsets = [8, 0], sizes = [8, 128], strides = [1, 1]} : vector<16x128xf32> to vector<8x128xf32>
    %c0_112 = arith.constant 0 : index
    %c0_113 = arith.constant 0 : index
    %186 = vector.load %arg3[%c0_112, %c0_113] : memref<128x128xbf16, #tpu.memory_space<vmem>>, vector<128x128xbf16>
    %187 = arith.truncf %185 : vector<8x128xf32> to vector<8x128xbf16>
    %cst_114 = arith.constant dense<0.000000e+00> : vector<8x128xf32>
    %188 = tpu.matmul %187, %186, %cst_114 {dimension_numbers = #tpu.dot_dimension_numbers<[1], [0], [0], [1], [0, 0, 1, 1], [], []>} : vector<8x128xbf16>, vector<128x128xbf16>, vector<8x128xf32> -> vector<8x128xf32>
    %189 = tpu.concatenate %184, %188 in 0 : vector<8x128xf32>, vector<8x128xf32> -> vector<16x128xf32>
    %190 = tpu.concatenate %189, %1 in 0 : vector<16x128xf32>, vector<5x128xf32> -> vector<21x128xf32>
    %c64_115 = arith.constant 64 : index
    %c0_116 = arith.constant 0 : index
    %191 = vector.load %arg8[%c64_115, %c0_116] : memref<80x21xbf16, #tpu.memory_space<vmem>>, vector<16x21xbf16>
    %192 = arith.truncf %190 : vector<21x128xf32> to vector<21x128xbf16>
    %cst_117 = arith.constant dense<0.000000e+00> : vector<16x128xf32>
    %193 = tpu.matmul %191, %192, %cst_117 {dimension_numbers = #tpu.dot_dimension_numbers<[1], [0], [0], [1], [0, 0, 1, 1], [], []>} : vector<16x21xbf16>, vector<21x128xbf16>, vector<16x128xf32> -> vector<16x128xf32>
    %cst_118 = arith.constant 0.000000e+00 : f32
    %194 = vector.broadcast %cst_118 : f32 to vector<16x128xf32>
    %195 = arith.maximumf %193, %194 : vector<16x128xf32>
    %196 = vector.extract_strided_slice %195 {offsets = [0, 0], sizes = [8, 128], strides = [1, 1]} : vector<16x128xf32> to vector<8x128xf32>
    %197 = vector.extract_strided_slice %195 {offsets = [8, 0], sizes = [8, 128], strides = [1, 1]} : vector<16x128xf32> to vector<8x128xf32>
    %c0_119 = arith.constant 0 : index
    %c0_120 = arith.constant 0 : index
    %198 = vector.load %arg3[%c0_119, %c0_120] : memref<128x128xbf16, #tpu.memory_space<vmem>>, vector<128x128xbf16>
    %199 = arith.truncf %197 : vector<8x128xf32> to vector<8x128xbf16>
    %cst_121 = arith.constant dense<0.000000e+00> : vector<8x128xf32>
    %200 = tpu.matmul %199, %198, %cst_121 {dimension_numbers = #tpu.dot_dimension_numbers<[1], [0], [0], [1], [0, 0, 1, 1], [], []>} : vector<8x128xbf16>, vector<128x128xbf16>, vector<8x128xf32> -> vector<8x128xf32>
    %201 = tpu.concatenate %196, %200, %2 in 0 : vector<8x128xf32>, vector<8x128xf32>, vector<1x128xf32> -> vector<17x128xf32>
    %c128 = arith.constant 128 : index
    %c0_122 = arith.constant 0 : index
    %202 = vector.load %arg7[%c128, %c0_122] : memref<148x17xbf16, #tpu.memory_space<vmem>>, vector<16x17xbf16>
    %203 = arith.truncf %201 : vector<17x128xf32> to vector<17x128xbf16>
    %cst_123 = arith.constant dense<0.000000e+00> : vector<16x128xf32>
    %204 = tpu.matmul %202, %203, %cst_123 {dimension_numbers = #tpu.dot_dimension_numbers<[1], [0], [0], [1], [0, 0, 1, 1], [], []>} : vector<16x17xbf16>, vector<17x128xbf16>, vector<16x128xf32> -> vector<16x128xf32>
    %205 = vector.extract_strided_slice %204 {offsets = [0, 0], sizes = [8, 128], strides = [1, 1]} : vector<16x128xf32> to vector<8x128xf32>
    %206 = vector.extract_strided_slice %204 {offsets = [8, 0], sizes = [8, 128], strides = [1, 1]} : vector<16x128xf32> to vector<8x128xf32>
    %c0_124 = arith.constant 0 : index
    %c0_125 = arith.constant 0 : index
    %207 = vector.load %arg3[%c0_124, %c0_125] : memref<128x128xbf16, #tpu.memory_space<vmem>>, vector<128x128xbf16>
    %208 = arith.truncf %206 : vector<8x128xf32> to vector<8x128xbf16>
    %cst_126 = arith.constant dense<0.000000e+00> : vector<8x128xf32>
    %209 = tpu.matmul %208, %207, %cst_126 {dimension_numbers = #tpu.dot_dimension_numbers<[1], [0], [0], [1], [0, 0, 1, 1], [], []>} : vector<8x128xbf16>, vector<128x128xbf16>, vector<8x128xf32> -> vector<8x128xf32>
    %210 = tpu.concatenate %205, %209 in 0 : vector<8x128xf32>, vector<8x128xf32> -> vector<16x128xf32>
    %c0_127 = arith.constant 0 : index
    %c0_128 = arith.constant 0 : index
    %211 = vector.load %arg4[%c0_127, %c0_128] : memref<128x128xbf16, #tpu.memory_space<vmem>>, vector<128x128xbf16>
    %212 = arith.truncf %210 : vector<16x128xf32> to vector<16x128xbf16>
    %cst_129 = arith.constant dense<0.000000e+00> : vector<16x128xf32>
    %213 = tpu.matmul %212, %211, %cst_129 {dimension_numbers = #tpu.dot_dimension_numbers<[1], [0], [0], [1], [0, 0, 1, 1], [], []>} : vector<16x128xbf16>, vector<128x128xbf16>, vector<16x128xf32> -> vector<16x128xf32>
    %214 = tpu.concatenate %189, %213, %2 in 0 : vector<16x128xf32>, vector<16x128xf32>, vector<1x128xf32> -> vector<33x128xf32>
    %c48_130 = arith.constant 48 : index
    %c0_131 = arith.constant 0 : index
    %215 = vector.load %arg9[%c48_130, %c0_131] : memref<64x33xbf16, #tpu.memory_space<vmem>>, vector<16x33xbf16>
    %216 = arith.truncf %214 : vector<33x128xf32> to vector<33x128xbf16>
    %cst_132 = arith.constant dense<0.000000e+00> : vector<16x128xf32>
    %217 = tpu.matmul %215, %216, %cst_132 {dimension_numbers = #tpu.dot_dimension_numbers<[1], [0], [0], [1], [0, 0, 1, 1], [], []>} : vector<16x33xbf16>, vector<33x128xbf16>, vector<16x128xf32> -> vector<16x128xf32>
    %cst_133 = arith.constant 0.000000e+00 : f32
    %218 = vector.broadcast %cst_133 : f32 to vector<16x128xf32>
    %219 = arith.maximumf %217, %218 : vector<16x128xf32>
    %220 = vector.extract_strided_slice %219 {offsets = [0, 0], sizes = [8, 128], strides = [1, 1]} : vector<16x128xf32> to vector<8x128xf32>
    %221 = vector.extract_strided_slice %219 {offsets = [8, 0], sizes = [8, 128], strides = [1, 1]} : vector<16x128xf32> to vector<8x128xf32>
    %c0_134 = arith.constant 0 : index
    %c0_135 = arith.constant 0 : index
    %222 = vector.load %arg3[%c0_134, %c0_135] : memref<128x128xbf16, #tpu.memory_space<vmem>>, vector<128x128xbf16>
    %223 = arith.truncf %221 : vector<8x128xf32> to vector<8x128xbf16>
    %cst_136 = arith.constant dense<0.000000e+00> : vector<8x128xf32>
    %224 = tpu.matmul %223, %222, %cst_136 {dimension_numbers = #tpu.dot_dimension_numbers<[1], [0], [0], [1], [0, 0, 1, 1], [], []>} : vector<8x128xbf16>, vector<128x128xbf16>, vector<8x128xf32> -> vector<8x128xf32>
    %225 = tpu.concatenate %220, %224, %2 in 0 : vector<8x128xf32>, vector<8x128xf32>, vector<1x128xf32> -> vector<17x128xf32>
    %c144 = arith.constant 144 : index
    %c0_137 = arith.constant 0 : index
    %226 = vector.load %arg7[%c144, %c0_137] : memref<148x17xbf16, #tpu.memory_space<vmem>>, vector<4x17xbf16>
    %227 = arith.truncf %225 : vector<17x128xf32> to vector<17x128xbf16>
    %cst_138 = arith.constant dense<0.000000e+00> : vector<4x128xf32>
    %228 = tpu.matmul %226, %227, %cst_138 {dimension_numbers = #tpu.dot_dimension_numbers<[1], [0], [0], [1], [0, 0, 1, 1], [], []>} : vector<4x17xbf16>, vector<17x128xbf16>, vector<4x128xf32> -> vector<4x128xf32>
    %c0_139 = arith.constant 0 : index
    %c0_140 = arith.constant 0 : index
    %229 = memref.load %arg1[%c0_139, %c0_140] : memref<1x1xf32, #tpu.memory_space<smem>>
    %c8_i32 = arith.constant 8 : i32
    %230 = tpu.dynamic_rotate %228 by %c8_i32 dim 1 : vector<4x128xf32>, i32 -> vector<4x128xf32>
    %231 = arith.maximumf %228, %230 : vector<4x128xf32>
    %c16_i32 = arith.constant 16 : i32
    %232 = tpu.dynamic_rotate %231 by %c16_i32 dim 1 : vector<4x128xf32>, i32 -> vector<4x128xf32>
    %233 = arith.maximumf %231, %232 : vector<4x128xf32>
    %c32_i32 = arith.constant 32 : i32
    %234 = tpu.dynamic_rotate %233 by %c32_i32 dim 1 : vector<4x128xf32>, i32 -> vector<4x128xf32>
    %235 = arith.maximumf %233, %234 : vector<4x128xf32>
    %c64_i32 = arith.constant 64 : i32
    %236 = tpu.dynamic_rotate %235 by %c64_i32 dim 1 : vector<4x128xf32>, i32 -> vector<4x128xf32>
    %237 = arith.maximumf %235, %236 : vector<4x128xf32>
    %238 = arith.subf %228, %237 : vector<4x128xf32>
    %239 = vector.broadcast %229 : f32 to vector<4x128xf32>
    %240 = arith.mulf %238, %239 : vector<4x128xf32>
    %241 = math.exp %240 : vector<4x128xf32>
    %c0_141 = arith.constant 0 : index
    %c0_142 = arith.constant 0 : index
    %242 = vector.load %arg5[%c0_141, %c0_142] : memref<128x128xf32, #tpu.memory_space<vmem>>, vector<128x128xf32>
    %cst_143 = arith.constant dense<0.000000e+00> : vector<4x128xf32>
    %243 = tpu.matmul %241, %242, %cst_143 {dimension_numbers = #tpu.dot_dimension_numbers<[1], [0], [0], [1], [0, 0, 1, 1], [], []>} : vector<4x128xf32>, vector<128x128xf32>, vector<4x128xf32> -> vector<4x128xf32>
    %cst_144 = arith.constant 1.000000e-30 : f32
    %244 = vector.broadcast %cst_144 : f32 to vector<4x128xf32>
    %245 = arith.maximumf %243, %244 : vector<4x128xf32>
    %246 = tpu.reciprocal %245 : vector<4x128xf32> -> vector<4x128xf32>
    %247 = arith.mulf %241, %246 : vector<4x128xf32>
    %248 = tpu.concatenate %228, %247 in 0 : vector<4x128xf32>, vector<4x128xf32> -> vector<8x128xf32>
    %c0_145 = arith.constant 0 : index
    %c0_146 = arith.constant 0 : index
    %c0_147 = arith.constant 0 : index
    %249 = vector.load %arg10[%c0_145, %c0_146, %c0_147] : memref<1x8x128xf32, #tpu.memory_space<vmem>>, vector<1x8x128xf32>
    %250 = vector.shape_cast %249 : vector<1x8x128xf32> to vector<8x128xf32>
    %251 = vector.shape_cast %248 : vector<8x128xf32> to vector<1x8x128xf32>
    tpu.vector_store %arg10[%c0_145, %c0_146, %c0_147], %251 {strides = array<i32>} : memref<1x8x128xf32, #tpu.memory_space<vmem>>, vector<1x8x128xf32>,
    return
  }
  func.func @transform_0(%arg0: i32) -> (i32, i32) {
    %c0_i32 = arith.constant 0 : i32
    %c0_i32_0 = arith.constant 0 : i32
    %c0_i32_1 = arith.constant 0 : i32
    return %c0_i32, %c0_i32_0 : i32, i32
  }
  func.func @transform_1(%arg0: i32) -> (i32, i32, i32) {
    %c0_i32 = arith.constant 0 : i32
    %c0_i32_0 = arith.constant 0 : i32
    %c0_i32_1 = arith.constant 0 : i32
    return %arg0, %c0_i32, %c0_i32_0 : i32, i32, i32
  }
  func.func @transform_2(%arg0: i32) -> (i32, i32) {
    %c0_i32 = arith.constant 0 : i32
    %c0_i32_0 = arith.constant 0 : i32
    %c0_i32_1 = arith.constant 0 : i32
    return %c0_i32, %c0_i32_0 : i32, i32
  }
  func.func @transform_3(%arg0: i32) -> (i32, i32) {
    %c0_i32 = arith.constant 0 : i32
    %c0_i32_0 = arith.constant 0 : i32
    %c0_i32_1 = arith.constant 0 : i32
    return %c0_i32, %c0_i32_0 : i32, i32
  }
  func.func @transform_4(%arg0: i32) -> (i32, i32) {
    %c0_i32 = arith.constant 0 : i32
    %c0_i32_0 = arith.constant 0 : i32
    %c0_i32_1 = arith.constant 0 : i32
    return %c0_i32, %c0_i32_0 : i32, i32
  }
  func.func @transform_5(%arg0: i32) -> (i32, i32) {
    %c0_i32 = arith.constant 0 : i32
    %c0_i32_0 = arith.constant 0 : i32
    %c0_i32_1 = arith.constant 0 : i32
    return %c0_i32, %c0_i32_0 : i32, i32
  }
  func.func @transform_6(%arg0: i32) -> (i32, i32) {
    %c0_i32 = arith.constant 0 : i32
    %c0_i32_0 = arith.constant 0 : i32
    %c0_i32_1 = arith.constant 0 : i32
    return %c0_i32, %c0_i32_0 : i32, i32
  }
  func.func @transform_7(%arg0: i32) -> (i32, i32) {
    %c0_i32 = arith.constant 0 : i32
    %c0_i32_0 = arith.constant 0 : i32
    %c0_i32_1 = arith.constant 0 : i32
    return %c0_i32, %c0_i32_0 : i32, i32
  }
  func.func @transform_8(%arg0: i32) -> (i32, i32) {
    %c0_i32 = arith.constant 0 : i32
    %c0_i32_0 = arith.constant 0 : i32
    %c0_i32_1 = arith.constant 0 : i32
    return %c0_i32, %c0_i32_0 : i32, i32
  }
  func.func @transform_9(%arg0: i32) -> (i32, i32, i32) {
    %c0_i32 = arith.constant 0 : i32
    %c0_i32_0 = arith.constant 0 : i32
    %c0_i32_1 = arith.constant 0 : i32
    return %arg0, %c0_i32, %c0_i32_0 : i32, i32, i32
  }
}

</mosaic_0001>

<bundles_post_ra>
// kernel: tpu_custom_call.1
= control target key start
LH: loop header
LB: loop body
LE: loop exit
PB: predicated region body
PF: predicated region fallthrough
CT: control target
= control target key end

     0   :  { %15 = vsyncpa [#allocation4], 0  ;;  %s4418_s0 = inlined_call_operand.<no memory space> [shape: f32[1,1], index: 0, kind: input, shape index: {}]   ;;  %s4419_s1 = inlined_call_operand.vmem [shape: f32[1,5,128], index: 1, kind: input, shape index: {}]   ;;  %s4420_s2 = inlined_call_operand.vmem [shape: bf16[128,128], index: 2, kind: input, shape index: {}]   ;;  %s4421_s3 = inlined_call_operand.hbm [shape: bf16[128,128], index: 3, kind: input, shape index: {}]   ;;  %s4422_s4 = inlined_call_operand.vmem [shape: f32[128,128], index: 4, kind: input, shape index: {}]   ;;  %s4423_s5 = inlined_call_operand.vmem [shape: bf16[16,5], index: 5, kind: input, shape index: {}]   ;;  %s4424_s6 = inlined_call_operand.vmem [shape: bf16[148,17], index: 6, kind: input, shape index: {}]   ;;  %s4425_s7 = inlined_call_operand.vmem [shape: bf16[80,21], index: 7, kind: input, shape index: {}]   ;;  %s4426_s8 = inlined_call_operand.vmem [shape: bf16[64,33], index: 8, kind: input, shape index: {}]   ;;  %s4427_s9 = inlined_call_operand.hbm [shape: f32[1,8,128], index: 9, kind: output, shape index: {}]  }
   0x1   :  { %16 = vsyncpa [#allocation5], 0  ;;  %s3545_s30 = smov [#allocation3]   ;;  %s3497_s13 = scalar_lea.hbm %s4421_s3, 1024 }
   0x2   :  { %s28_s10 = sshll.u32 %s3545_s30, 4  ;;  %p3498_p0 = scmp.ne.s32.totalorder %s4421_s3, %s3497_s13  ;;  %s29_s10 = int_to_ptr.vmem [resolvable:$true] %s28_s10 }
   0x3   :  { %p3501_p1 = scmp.lt.u32.totalorder %s3497_s13, %s4421_s3 }
   0x5   :  { %p3503_p2 = pnand %p3501_p1, %p3498_p0 }
   0x7   :  { %3506 = shalt.err (!%p3503_p2)
}
   0x8   :  { %s3507_s18 = scalar_lea.vmem %s29_s10, 1024  ;;  %p3512_p4 = scmp.lt.s32.totalorder %s29_s10, %s29_s10 }
   0x9   :  { %p3508_p3 = scmp.ne.s32.totalorder %s29_s10, %s3507_s18  ;;  %p3513_p5 = scmp.lt.s32.totalorder %s3507_s18, %s3507_s18 }
   0xb   :  { %p3514_p6 = por %p3513_p5, %p3512_p4 }
   0xd   :  { %p3515_p7 = pnand %p3514_p6, %p3508_p3 }
   0xf   :  { %3518 = shalt.err (!%p3515_p7)
}
  0x10   :  { %s3546_s19 = smov 64   ;;  %s3547_s20 = smov 4  }
  0x11   :  { %34 = dma.hbm_to_vmem [thread:$0]  %s4421_s3, 1024, %s29_s10, [#allocation4], %s3546_s19, %s3546_s19, %s3547_s20  }
  0x12   :  { %3541 = dma.done.wait [#allocation4], 1024  }
  0x13   :  { %3542 = vsyncadd [#allocation4], 4294966272  ;;  %vm62_vm0 = vcmask 1041408   ;;  %v3548_v0 = vmov 0.0   ;;  %vm3549_vm1 = vmmov 0   ;;  %vm63_vm2 = vcmask 1042432  }
  0x14   :  { %2725 = vmatprep.subr.bf16.mxu0 %v3548_v0  ;;  %2731 = vmatprep.subr.bf16.mxu1 %v3548_v0  ;;  %v3550_v1 = vmov 65535   ;;  %v49_v4 = vld [vmem:[%s4419_s1] sm:$0x1f]  ;;  %v3644_v9 = vld [vmem:[%s4420_s2 + $0x8] sm:$0xff]   ;;  %vm58_vm3 = vcmask 39936   ;;  %v3652_v10 = vld [vmem:[%s4420_s2 + $0x10] sm:$0xff]  }
  0x15   :  { %2727 = vmatprep.mubr.msk.bf16.mxu0 %vm3549_vm1, %v3548_v0  ;;  %2747 = vmatprep.mubr.msk.bf16.mxu1 %vm3549_vm1, %v3548_v0  ;;  %v64_v2 = vsel %vm62_vm0, 4294967295, %v3550_v1  ;;  %v52_v5 = vpack.c.bf16 %v49_v4, %v49_v4  ;;  %v3633_v6 = vld [vmem:[%s4420_s2] sm:$0xff]   ;;  %v3660_v11 = vld [vmem:[%s4420_s2 + $0x18] sm:$0xff]   ;;  %v3680_v13 = vld [vmem:[%s4420_s2 + $0x28] sm:$0xff]   ;;  %vm230_vm4 = vcmask 1040384   ;;  %v3551_v24 = vmov 0  }
  0x16   :  { %v65_v3 = vsel %vm63_vm2, %v64_v2, 0  ;;  %v3442_v8 = vld [vmem:[%s4423_s5] sm:$0xff]   ;;  %2732 = vmatpush3.bf16.msra.mxu1 %v3633_v6  ;;  %v3696_v14 = vld [vmem:[%s4420_s2 + $0x30] sm:$0xff]   ;;  %v3705_v15 = vld [vmem:[%s4420_s2 + $0x38] sm:$0xff]   ;;  %v232_v25 = vsel %vm230_vm4, 65535, %v3551_v24  ;;  %vm226_vm5 = vcmask 138240  }
  0x17   :  { %v3635_v7 = vand.u32 %v65_v3, %v52_v5  ;;  %2733 = vmatprep.subr.bf16.mxu1 %v3548_v0  ;;  %v3671_v12 = vld [vmem:[%s4420_s2 + $0x20] sm:$0xff]   ;;  %v3713_v30 = vand.u32 1.0|1.0, %v232_v25  ;;  %v3727_v33 = vld [vmem:[#allocation3 + $0x8] sm:$0xff]   ;;  %v3731_v34 = vld [vmem:[#allocation3 + $0x10] sm:$0xff]   ;;  %vm432_vm6 = vcmask 171008  }
  0x18   :  { %v3451_v31 = vld [vmem:[%s4424_s6] sm:$0xff]   ;;  %v3735_v35 = vld [vmem:[#allocation3 + $0x18] sm:$0xff]   ;;  %v3743_v37 = vld [vmem:[#allocation3 + $0x28] sm:$0xff]   ;;  %vm853_vm7 = vcmask 269312   ;;  %s3552_s24 = smov 8   ;;  %s3553_s25 = smov 16  }
  0x19   :  { %2726 = vmatpush3.bf16.msra.mxu0 %v3635_v7  ;;  %v3724_v32 = vld [vmem:[#allocation3] sm:$0xff]   ;;  %v3747_v38 = vld [vmem:[#allocation3 + $0x30] sm:$0xff]   ;;  %v3754_v44 = vld [vmem:[#allocation3 + $0x38] sm:$0xff]   ;;  %s3555_s13 = smov 32   ;;  %vm2356_vm8 = vcmask 1043456  }
  0x1a   :  { %2759 = vmatprep.subr.bf16.mxu0 %v3548_v0  ;;  %2734 = vmatpush3.bf16.msra.mxu1 %v3644_v9  ;;  %v3739_v36 = vld [vmem:[#allocation3 + $0x20] sm:$0xff]   ;;  %v3461_v5 = vld [vmem:[%s4424_s6 + $0x8] sm:$0xff]  }
  0x1b   :  { %2735 = vmatprep.subr.bf16.mxu1 %v3548_v0  ;;  %v3460_v55 = vld [vmem:[%s4425_s7] sm:$0xff]  }
  0x1c   :  { %2728 = vmatmul.mubr.msk.bf16.vlgmr.msra.gmra.mrb[0].mxu0 %vm58_vm3, %v3442_v8 }
  0x1d   :  { %2760 = vmatpush3.bf16.msra.mxu0 %v3633_v6  ;;  %2775 = vmatprep.mubr.msk.bf16.mxu0 %vm3549_vm1, %v3548_v0 }
  0x1e   :  { %2761 = vmatprep.subr.bf16.mxu0 %v3548_v0  ;;  %2736 = vmatpush3.bf16.msra.mxu1 %v3652_v10 }
  0x1f   :  { %2737 = vmatprep.subr.bf16.mxu1 %v3548_v0 }
  0x21   :  { %2762 = vmatpush3.bf16.msra.mxu0 %v3644_v9 }
  0x22   :  { %2763 = vmatprep.subr.bf16.mxu0 %v3548_v0  ;;  %2738 = vmatpush3.bf16.msra.mxu1 %v3660_v11 }
  0x23   :  { %2739 = vmatprep.subr.bf16.mxu1 %v3548_v0 }
  0x25   :  { %2764 = vmatpush3.bf16.msra.mxu0 %v3652_v10 }
  0x26   :  { %2765 = vmatprep.subr.bf16.mxu0 %v3548_v0  ;;  %2740 = vmatpush3.bf16.msra.mxu1 %v3671_v12 }
  0x27   :  { %2741 = vmatprep.subr.bf16.mxu1 %v3548_v0 }
  0x29   :  { %2766 = vmatpush3.bf16.msra.mxu0 %v3660_v11 }
  0x2a   :  { %2767 = vmatprep.subr.bf16.mxu0 %v3548_v0  ;;  %2742 = vmatpush3.bf16.msra.mxu1 %v3680_v13 }
  0x2b   :  { %2743 = vmatprep.subr.bf16.mxu1 %v3548_v0 }
  0x2d   :  { %2768 = vmatpush3.bf16.msra.mxu0 %v3671_v12 }
  0x2e   :  { %2769 = vmatprep.subr.bf16.mxu0 %v3548_v0  ;;  %2744 = vmatpush3.bf16.msra.mxu1 %v3696_v14 }
  0x2f   :  { %2745 = vmatprep.subr.bf16.mxu1 %v3548_v0 }
  0x31   :  { %2770 = vmatpush3.bf16.msra.mxu0 %v3680_v13 }
  0x32   :  { %2771 = vmatprep.subr.bf16.mxu0 %v3548_v0  ;;  %2746 = vmatpush3.bf16.msra.mxu1 %v3705_v15 }
  0x33   :  { %2751 = vmatprep.subr.bf16.mxu1 %v3548_v0 }
  0x35   :  { %2772 = vmatpush3.bf16.msra.mxu0 %v3696_v14 }
  0x36   :  { %2773 = vmatprep.subr.bf16.mxu0 %v3548_v0 }
  0x39   :  { %2774 = vmatpush3.bf16.msra.mxu0 %v3705_v15 }
  0x3a   :  { %2799 = vmatprep.subr.bf16.mxu0 %v3548_v0 }
  0xef   :  { %v103_v16 = vpop.f32.mrb[0].mxu0 }
  0xf0   :  { %v2729_v17 = vpop.f32.mrb[1].mxu0  ;;  %v110_v22 = vmax.f32 %v103_v16, 0.0 }
  0xf1   :  { %v106_v18 = vpop.f32.mrb[2].mxu0 }
  0xf2   :  { %v111_v19 = vmax.f32 %v106_v18, 0.0  ;;  %v2730_v20 = vpop.f32.mrb[3].mxu0 }
  0xf4   :  { %v128_v21 = vpack.c.bf16 %v111_v19, %v111_v19 }
  0xf6   :  { %2748 = vmatmul.mubr.bf16.vlgmr.msra.gmra.mrb[0].mxu1 %v128_v21 }
  0xf7   :  { %2755 = vmatprep.mubr.msk.bf16.mxu1 %vm3549_vm1, %v3548_v0 }
 0x1c9   :  { %v211_v23 = vpop.f32.mrb[0].mxu1 }
 0x1ca   :  { %v219_v26 = vpack.c.bf16 %v211_v23, %v110_v22  ;;  %v2749_v27 = vpop.f32.mrb[1].mxu1 }
 0x1cb   :  { %v214_v28 = vpop.f32.mrb[2].mxu1  ;;  %v3462_v27 = vld [vmem:[%s4425_s7 + $0x8] sm:$0xff]  }
 0x1cc   :  { %v2750_v29 = vpop.f32.mrb[3].mxu1  ;;  %2752 = vmatpush3.bf16.msra.mxu1 %v219_v26 }
 0x1cd   :  { %2753 = vmatprep.subr.bf16.mxu1 %v3548_v0 }
 0x1d0   :  { %2754 = vmatpush3.bf16.msra.mxu1 %v3713_v30 }
 0x1d1   :  { %2779 = vmatprep.subr.bf16.mxu1 %v3548_v0 }
 0x1d3   :  { %2756 = vmatmul.mubr.msk.bf16.vlgmr.msra.gmra.mrb[4].mxu1 %vm226_vm5, %v3451_v31 }
 0x1d4   :  { %2795 = vmatprep.mubr.msk.bf16.mxu1 %vm3549_vm1, %v3548_v0  ;;  %2780 = vmatpush3.bf16.msra.mxu1 %v3724_v32 }
 0x1d5   :  { %2781 = vmatprep.subr.bf16.mxu1 %v3548_v0 }
 0x1d8   :  { %2782 = vmatpush3.bf16.msra.mxu1 %v3727_v33 }
 0x1d9   :  { %2783 = vmatprep.subr.bf16.mxu1 %v3548_v0 }
 0x1dc   :  { %2784 = vmatpush3.bf16.msra.mxu1 %v3731_v34 }
 0x1dd   :  { %2785 = vmatprep.subr.bf16.mxu1 %v3548_v0 }
 0x1e0   :  { %2786 = vmatpush3.bf16.msra.mxu1 %v3735_v35 }
 0x1e1   :  { %2787 = vmatprep.subr.bf16.mxu1 %v3548_v0 }
 0x1e4   :  { %2788 = vmatpush3.bf16.msra.mxu1 %v3739_v36 }
 0x1e5   :  { %2789 = vmatprep.subr.bf16.mxu1 %v3548_v0 }
 0x1e8   :  { %2790 = vmatpush3.bf16.msra.mxu1 %v3743_v37 }
 0x1e9   :  { %2791 = vmatprep.subr.bf16.mxu1 %v3548_v0 }
 0x1ec   :  { %2792 = vmatpush3.bf16.msra.mxu1 %v3747_v38 }
 0x1ed   :  { %2793 = vmatprep.subr.bf16.mxu1 %v3548_v0 }
 0x1f0   :  { %2794 = vmatpush3.bf16.msra.mxu1 %v3754_v44 }
 0x1f1   :  { %2827 = vmatprep.subr.bf16.mxu1 %v3548_v0 }
 0x2a6   :  { %v270_v39 = vpop.f32.mrb[4].mxu1 }
 0x2a7   :  { %v2757_v40 = vpop.f32.mrb[5].mxu1 }
 0x2a8   :  { %v273_v41 = vpop.f32.mrb[6].mxu1 }
 0x2a9   :  { %v277_v42 = vpack.c.bf16 %v273_v41, %v273_v41  ;;  %v2758_v43 = vpop.f32.mrb[7].mxu1 }
 0x2ab   :  { %2776 = vmatmul.mubr.bf16.vlgmr.msra.gmra.mrb[4].mxu0 %v277_v42 }
 0x2ac   :  { %2803 = vmatprep.mubr.msk.bf16.mxu0 %vm3549_vm1, %v3548_v0 }
 0x37e   :  { %v312_v45 = vpop.f32.mrb[4].mxu0 }
 0x37f   :  { %v334_v46 = vpack.c.bf16 %v312_v45, %v270_v39  ;;  %v2777_v47 = vpop.f32.mrb[5].mxu0 }
 0x380   :  { %v315_v48 = vpop.f32.mrb[6].mxu0 }
 0x381   :  { %v2778_v49 = vpop.f32.mrb[7].mxu0  ;;  %2796 = vmatmul.mubr.bf16.vlgmr.msra.gmra.mrb[8].mxu1 %v334_v46 }
 0x382   :  { %2831 = vmatprep.mubr.msk.bf16.mxu1 %vm3549_vm1, %v3548_v0  ;;  %v3463_v49 = vld [vmem:[%s4424_s6 + $0x10] sm:$0xff]  }
 0x454   :  { %v417_v50 = vpop.f32.mrb[8].mxu1 }
 0x455   :  { %v2797_v51 = vpop.f32.mrb[9].mxu1 }
 0x456   :  { %v420_v52 = vpop.f32.mrb[10].mxu1 }
 0x457   :  { %v426_v53 = vpack.c.bf16 %v420_v52, %v417_v50  ;;  %v2798_v54 = vpop.f32.mrb[11].mxu1 }
 0x459   :  { %2800 = vmatpush3.bf16.msra.mxu0 %v426_v53 }
 0x45a   :  { %2801 = vmatprep.subr.bf16.mxu0 %v3548_v0 }
 0x45d   :  { %2802 = vmatpush3.bf16.msra.mxu0 %v3635_v7 }
 0x45e   :  { %2807 = vmatprep.subr.bf16.mxu0 %v3548_v0 }
 0x460   :  { %2804 = vmatmul.mubr.msk.bf16.vlgmr.msra.gmra.mrb[8].mxu0 %vm432_vm6, %v3460_v55 }
 0x461   :  { %2808 = vmatpush3.bf16.msra.mxu0 %v3633_v6  ;;  %2823 = vmatprep.mubr.msk.bf16.mxu0 %vm3549_vm1, %v3548_v0 }
 0x462   :  { %2809 = vmatprep.subr.bf16.mxu0 %v3548_v0 }
 0x465   :  { %2810 = vmatpush3.bf16.msra.mxu0 %v3644_v9 }
 0x466   :  { %2811 = vmatprep.subr.bf16.mxu0 %v3548_v0 }
 0x469   :  { %2812 = vmatpush3.bf16.msra.mxu0 %v3652_v10 }
 0x46a   :  { %2813 = vmatprep.subr.bf16.mxu0 %v3548_v0 }
 0x46d   :  { %2814 = vmatpush3.bf16.msra.mxu0 %v3660_v11 }
 0x46e   :  { %2815 = vmatprep.subr.bf16.mxu0 %v3548_v0 }
 0x471   :  { %2816 = vmatpush3.bf16.msra.mxu0 %v3671_v12 }
 0x472   :  { %2817 = vmatprep.subr.bf16.mxu0 %v3548_v0 }
 0x475   :  { %2818 = vmatpush3.bf16.msra.mxu0 %v3680_v13 }
 0x476   :  { %2819 = vmatprep.subr.bf16.mxu0 %v3548_v0 }
 0x479   :  { %2820 = vmatpush3.bf16.msra.mxu0 %v3696_v14 }
 0x47a   :  { %2821 = vmatprep.subr.bf16.mxu0 %v3548_v0 }
 0x47d   :  { %2822 = vmatpush3.bf16.msra.mxu0 %v3705_v15 }
 0x47e   :  { %2855 = vmatprep.subr.bf16.mxu0 %v3548_v0 }
 0x533   :  { %v470_v56 = vpop.f32.mrb[8].mxu0 }
 0x534   :  { %v2805_v57 = vpop.f32.mrb[9].mxu0  ;;  %v477_v62 = vmax.f32 %v470_v56, 0.0 }
 0x535   :  { %v473_v58 = vpop.f32.mrb[10].mxu0 }
 0x536   :  { %v478_v59 = vmax.f32 %v473_v58, 0.0  ;;  %v2806_v60 = vpop.f32.mrb[11].mxu0 }
 0x538   :  { %v479_v61 = vpack.c.bf16 %v478_v59, %v478_v59 }
 0x53a   :  { %2824 = vmatmul.mubr.bf16.vlgmr.msra.gmra.mrb[12].mxu0 %v479_v61 }
 0x53b   :  { %2859 = vmatprep.mubr.msk.bf16.mxu0 %vm3549_vm1, %v3548_v0 }
 0x60d   :  { %v514_v63 = vpop.f32.mrb[12].mxu0 }
 0x60e   :  { %v522_v1 = vpack.c.bf16 %v514_v63, %v477_v62  ;;  %v2825_v2 = vpop.f32.mrb[13].mxu0 }
 0x60f   :  { %v517_v3 = vpop.f32.mrb[14].mxu0  ;;  %v3464_v2 = vld [vmem:[%s4426_s8] sm:$0xff]  }
 0x610   :  { %v2826_v4 = vpop.f32.mrb[15].mxu0  ;;  %2828 = vmatpush3.bf16.msra.mxu1 %v522_v1 }
 0x611   :  { %2829 = vmatprep.subr.bf16.mxu1 %v3548_v0 }
 0x614   :  { %2830 = vmatpush3.bf16.msra.mxu1 %v3713_v30 }
 0x615   :  { %2835 = vmatprep.subr.bf16.mxu1 %v3548_v0 }
 0x617   :  { %2832 = vmatmul.mubr.msk.bf16.vlgmr.msra.gmra.mrb[12].mxu1 %vm226_vm5, %v3461_v5 }
 0x618   :  { %2836 = vmatpush3.bf16.msra.mxu1 %v3633_v6  ;;  %2851 = vmatprep.mubr.msk.bf16.mxu1 %vm3549_vm1, %v3548_v0 }
 0x619   :  { %2837 = vmatprep.subr.bf16.mxu1 %v3548_v0 }
 0x61c   :  { %2838 = vmatpush3.bf16.msra.mxu1 %v3644_v9 }
 0x61d   :  { %2839 = vmatprep.subr.bf16.mxu1 %v3548_v0 }
 0x620   :  { %2840 = vmatpush3.bf16.msra.mxu1 %v3652_v10 }
 0x621   :  { %2841 = vmatprep.subr.bf16.mxu1 %v3548_v0 }
 0x624   :  { %2842 = vmatpush3.bf16.msra.mxu1 %v3660_v11 }
 0x625   :  { %2843 = vmatprep.subr.bf16.mxu1 %v3548_v0 }
 0x628   :  { %2844 = vmatpush3.bf16.msra.mxu1 %v3671_v12 }
 0x629   :  { %2845 = vmatprep.subr.bf16.mxu1 %v3548_v0 }
 0x62c   :  { %2846 = vmatpush3.bf16.msra.mxu1 %v3680_v13 }
 0x62d   :  { %2847 = vmatprep.subr.bf16.mxu1 %v3548_v0 }
 0x630   :  { %2848 = vmatpush3.bf16.msra.mxu1 %v3696_v14 }
 0x631   :  { %2849 = vmatprep.subr.bf16.mxu1 %v3548_v0 }
 0x634   :  { %2850 = vmatpush3.bf16.msra.mxu1 %v3705_v15 }
 0x635   :  { %2883 = vmatprep.subr.bf16.mxu1 %v3548_v0 }
 0x6ea   :  { %v565_v8 = vpop.f32.mrb[12].mxu1 }
 0x6eb   :  { %v2833_v16 = vpop.f32.mrb[13].mxu1  ;;  %v572_v21 = vmax.f32 %v565_v8, 0.0 }
 0x6ec   :  { %v568_v17 = vpop.f32.mrb[14].mxu1 }
 0x6ed   :  { %v573_v18 = vmax.f32 %v568_v17, 0.0  ;;  %v2834_v19 = vpop.f32.mrb[15].mxu1 }
 0x6ef   :  { %v574_v20 = vpack.c.bf16 %v573_v18, %v573_v18 }
 0x6f1   :  { %2852 = vmatmul.mubr.bf16.vlgmr.msra.gmra.mrb[16].mxu1 %v574_v20 }
 0x6f2   :  { %2887 = vmatprep.mubr.msk.bf16.mxu1 %vm3549_vm1, %v3548_v0 }
 0x7c4   :  { %v609_v22 = vpop.f32.mrb[16].mxu1 }
 0x7c5   :  { %v3814_v23 = vpack.c.bf16 %v609_v22, %v572_v21  ;;  %v2853_v24 = vpop.f32.mrb[17].mxu1 }
 0x7c6   :  { %v612_v25 = vpop.f32.mrb[18].mxu1  ;;  %v3465_v24 = vld [vmem:[%s4424_s6 + $0x18] sm:$0xff]  }
 0x7c7   :  { %v2854_v26 = vpop.f32.mrb[19].mxu1  ;;  %2856 = vmatpush3.bf16.msra.mxu0 %v3814_v23 }
 0x7c8   :  { %2857 = vmatprep.subr.bf16.mxu0 %v3548_v0 }
 0x7cb   :  { %2858 = vmatpush3.bf16.msra.mxu0 %v3635_v7 }
 0x7cc   :  { %2863 = vmatprep.subr.bf16.mxu0 %v3548_v0 }
 0x7ce   :  { %2860 = vmatmul.mubr.msk.bf16.vlgmr.msra.gmra.mrb[16].mxu0 %vm432_vm6, %v3462_v27 }
 0x7cf   :  { %2864 = vmatpush3.bf16.msra.mxu0 %v3633_v6  ;;  %2879 = vmatprep.mubr.msk.bf16.mxu0 %vm3549_vm1, %v3548_v0 }
 0x7d0   :  { %2865 = vmatprep.subr.bf16.mxu0 %v3548_v0 }
 0x7d3   :  { %2866 = vmatpush3.bf16.msra.mxu0 %v3644_v9 }
 0x7d4   :  { %2867 = vmatprep.subr.bf16.mxu0 %v3548_v0 }
 0x7d7   :  { %2868 = vmatpush3.bf16.msra.mxu0 %v3652_v10 }
 0x7d8   :  { %2869 = vmatprep.subr.bf16.mxu0 %v3548_v0 }
 0x7db   :  { %2870 = vmatpush3.bf16.msra.mxu0 %v3660_v11 }
 0x7dc   :  { %2871 = vmatprep.subr.bf16.mxu0 %v3548_v0 }
 0x7df   :  { %2872 = vmatpush3.bf16.msra.mxu0 %v3671_v12 }
 0x7e0   :  { %2873 = vmatprep.subr.bf16.mxu0 %v3548_v0 }
 0x7e3   :  { %2874 = vmatpush3.bf16.msra.mxu0 %v3680_v13 }
 0x7e4   :  { %2875 = vmatprep.subr.bf16.mxu0 %v3548_v0 }
 0x7e7   :  { %2876 = vmatpush3.bf16.msra.mxu0 %v3696_v14 }
 0x7e8   :  { %2877 = vmatprep.subr.bf16.mxu0 %v3548_v0 }
 0x7eb   :  { %2878 = vmatpush3.bf16.msra.mxu0 %v3705_v15 }
 0x7ec   :  { %2911 = vmatprep.subr.bf16.mxu0 %v3548_v0 }
 0x8a1   :  { %v660_v28 = vpop.f32.mrb[16].mxu0 }
 0x8a2   :  { %v2861_v29 = vpop.f32.mrb[17].mxu0  ;;  %v667_v42 = vmax.f32 %v660_v28, 0.0 }
 0x8a3   :  { %v663_v31 = vpop.f32.mrb[18].mxu0 }
 0x8a4   :  { %v668_v39 = vmax.f32 %v663_v31, 0.0  ;;  %v2862_v40 = vpop.f32.mrb[19].mxu0 }
 0x8a6   :  { %v669_v41 = vpack.c.bf16 %v668_v39, %v668_v39 }
 0x8a8   :  { %2880 = vmatmul.mubr.bf16.vlgmr.msra.gmra.mrb[20].mxu0 %v669_v41 }
 0x8a9   :  { %2912 = vmatpush3.bf16.msra.mxu0 %v3724_v32  ;;  %2927 = vmatprep.mubr.msk.bf16.mxu0 %vm3549_vm1, %v3548_v0 }
 0x8aa   :  { %2913 = vmatprep.subr.bf16.mxu0 %v3548_v0 }
 0x8ad   :  { %2914 = vmatpush3.bf16.msra.mxu0 %v3727_v33 }
 0x8ae   :  { %2915 = vmatprep.subr.bf16.mxu0 %v3548_v0 }
 0x8b1   :  { %2916 = vmatpush3.bf16.msra.mxu0 %v3731_v34 }
 0x8b2   :  { %2917 = vmatprep.subr.bf16.mxu0 %v3548_v0 }
 0x8b5   :  { %2918 = vmatpush3.bf16.msra.mxu0 %v3735_v35 }
 0x8b6   :  { %2919 = vmatprep.subr.bf16.mxu0 %v3548_v0 }
 0x8b9   :  { %2920 = vmatpush3.bf16.msra.mxu0 %v3739_v36 }
 0x8ba   :  { %2921 = vmatprep.subr.bf16.mxu0 %v3548_v0 }
 0x8bd   :  { %2922 = vmatpush3.bf16.msra.mxu0 %v3743_v37 }
 0x8be   :  { %2923 = vmatprep.subr.bf16.mxu0 %v3548_v0 }
 0x8c1   :  { %2924 = vmatpush3.bf16.msra.mxu0 %v3747_v38 }
 0x8c2   :  { %2925 = vmatprep.subr.bf16.mxu0 %v3548_v0 }
 0x8c5   :  { %2926 = vmatpush3.bf16.msra.mxu0 %v3754_v44 }
 0x8c6   :  { %2941 = vmatprep.subr.bf16.mxu0 %v3548_v0 }
 0x97b   :  { %v704_v43 = vpop.f32.mrb[20].mxu0 }
 0x97c   :  { %v712_v45 = vpack.c.bf16 %v704_v43, %v667_v42  ;;  %v2881_v46 = vpop.f32.mrb[21].mxu0 }
 0x97d   :  { %v707_v47 = vpop.f32.mrb[22].mxu0  ;;  %v3466_v46 = vld [vmem:[%s4425_s7 + $0x10] sm:$0xff]  }
 0x97e   :  { %v2882_v48 = vpop.f32.mrb[23].mxu0  ;;  %2884 = vmatpush3.bf16.msra.mxu1 %v712_v45 }
 0x97f   :  { %2885 = vmatprep.subr.bf16.mxu1 %v3548_v0 }
 0x982   :  { %2886 = vmatpush3.bf16.msra.mxu1 %v3713_v30 }
 0x983   :  { %2891 = vmatprep.subr.bf16.mxu1 %v3548_v0 }
 0x985   :  { %2888 = vmatmul.mubr.msk.bf16.vlgmr.msra.gmra.mrb[20].mxu1 %vm226_vm5, %v3463_v49 }
 0x986   :  { %2892 = vmatpush3.bf16.msra.mxu1 %v3633_v6  ;;  %2907 = vmatprep.mubr.msk.bf16.mxu1 %vm3549_vm1, %v3548_v0 }
 0x987   :  { %2893 = vmatprep.subr.bf16.mxu1 %v3548_v0 }
 0x98a   :  { %2894 = vmatpush3.bf16.msra.mxu1 %v3644_v9 }
 0x98b   :  { %2895 = vmatprep.subr.bf16.mxu1 %v3548_v0 }
 0x98e   :  { %2896 = vmatpush3.bf16.msra.mxu1 %v3652_v10 }
 0x98f   :  { %2897 = vmatprep.subr.bf16.mxu1 %v3548_v0 }
 0x992   :  { %2898 = vmatpush3.bf16.msra.mxu1 %v3660_v11 }
 0x993   :  { %2899 = vmatprep.subr.bf16.mxu1 %v3548_v0 }
 0x996   :  { %2900 = vmatpush3.bf16.msra.mxu1 %v3671_v12 }
 0x997   :  { %2901 = vmatprep.subr.bf16.mxu1 %v3548_v0 }
 0x99a   :  { %2902 = vmatpush3.bf16.msra.mxu1 %v3680_v13 }
 0x99b   :  { %2903 = vmatprep.subr.bf16.mxu1 %v3548_v0 }
 0x99e   :  { %2904 = vmatpush3.bf16.msra.mxu1 %v3696_v14 }
 0x99f   :  { %2905 = vmatprep.subr.bf16.mxu1 %v3548_v0 }
 0x9a2   :  { %2906 = vmatpush3.bf16.msra.mxu1 %v3705_v15 }
 0x9a3   :  { %2931 = vmatprep.subr.bf16.mxu1 %v3548_v0 }
 0xa58   :  { %v755_v50 = vpop.f32.mrb[20].mxu1 }
 0xa59   :  { %v2889_v51 = vpop.f32.mrb[21].mxu1 }
 0xa5a   :  { %v758_v52 = vpop.f32.mrb[22].mxu1 }
 0xa5b   :  { %v762_v53 = vpack.c.bf16 %v758_v52, %v758_v52  ;;  %v2890_v54 = vpop.f32.mrb[23].mxu1 }
 0xa5d   :  { %2908 = vmatmul.mubr.bf16.vlgmr.msra.gmra.mrb[24].mxu1 %v762_v53 }
 0xa5e   :  { %2932 = vmatpush3.bf16.msra.mxu1 %v3814_v23  ;;  %2937 = vmatprep.mubr.msk.bf16.mxu1 %vm3549_vm1, %v3548_v0 }
 0xa5f   :  { %2933 = vmatprep.subr.bf16.mxu1 %v3548_v0 }
 0xb30   :  { %v797_v55 = vpop.f32.mrb[24].mxu1 }
 0xb31   :  { %v803_v56 = vpack.c.bf16 %v797_v55, %v755_v50  ;;  %v2909_v57 = vpop.f32.mrb[25].mxu1 }
 0xb32   :  { %v800_v58 = vpop.f32.mrb[26].mxu1 }
 0xb33   :  { %v2910_v59 = vpop.f32.mrb[27].mxu1  ;;  %2928 = vmatmul.mubr.bf16.vlgmr.msra.gmra.mrb[24].mxu0 %v803_v56 }
 0xb34   :  { %2942 = vmatpush3.bf16.msra.mxu0 %v3633_v6  ;;  %2957 = vmatprep.mubr.msk.bf16.mxu0 %vm3549_vm1, %v3548_v0  ;;  %v3467_v59 = vld [vmem:[%s4424_s6 + $0x20] sm:$0xff]  }
 0xb35   :  { %2943 = vmatprep.subr.bf16.mxu0 %v3548_v0 }
 0xb38   :  { %2944 = vmatpush3.bf16.msra.mxu0 %v3644_v9 }
 0xb39   :  { %2945 = vmatprep.subr.bf16.mxu0 %v3548_v0 }
 0xb3c   :  { %2946 = vmatpush3.bf16.msra.mxu0 %v3652_v10 }
 0xb3d   :  { %2947 = vmatprep.subr.bf16.mxu0 %v3548_v0 }
 0xb40   :  { %2948 = vmatpush3.bf16.msra.mxu0 %v3660_v11 }
 0xb41   :  { %2949 = vmatprep.subr.bf16.mxu0 %v3548_v0 }
 0xb44   :  { %2950 = vmatpush3.bf16.msra.mxu0 %v3671_v12 }
 0xb45   :  { %2951 = vmatprep.subr.bf16.mxu0 %v3548_v0 }
 0xb48   :  { %2952 = vmatpush3.bf16.msra.mxu0 %v3680_v13 }
 0xb49   :  { %2953 = vmatprep.subr.bf16.mxu0 %v3548_v0 }
 0xb4c   :  { %2954 = vmatpush3.bf16.msra.mxu0 %v3696_v14 }
 0xb4d   :  { %2955 = vmatprep.subr.bf16.mxu0 %v3548_v0 }
 0xb50   :  { %2956 = vmatpush3.bf16.msra.mxu0 %v3705_v15 }
 0xb51   :  { %2989 = vmatprep.subr.bf16.mxu0 %v3548_v0 }
 0xc06   :  { %v838_v60 = vpop.f32.mrb[24].mxu0 }
 0xc07   :  { %v2929_v61 = vpop.f32.mrb[25].mxu0 }
 0xc08   :  { %v841_v62 = vpop.f32.mrb[26].mxu0 }
 0xc09   :  { %v847_v63 = vpack.c.bf16 %v841_v62, %v838_v60  ;;  %v2930_v1 = vpop.f32.mrb[27].mxu0 }
 0xc0b   :  { %2934 = vmatpush3.bf16.msra.mxu1 %v847_v63 }
 0xc0c   :  { %2935 = vmatprep.subr.bf16.mxu1 %v3548_v0 }
 0xc0f   :  { %2936 = vmatpush3.bf16.msra.mxu1 %v3713_v30 }
 0xc10   :  { %2961 = vmatprep.subr.bf16.mxu1 %v3548_v0 }
 0xc12   :  { %2938 = vmatmul.mubr.msk.bf16.vlgmr.msra.gmra.mrb[28].mxu1 %vm853_vm7, %v3464_v2 }
 0xc13   :  { %2965 = vmatprep.mubr.msk.bf16.mxu1 %vm3549_vm1, %v3548_v0 }
 0xce5   :  { %v891_v3 = vpop.f32.mrb[28].mxu1 }
 0xce6   :  { %v2939_v4 = vpop.f32.mrb[29].mxu1  ;;  %v898_v18 = vmax.f32 %v891_v3, 0.0 }
 0xce7   :  { %v894_v5 = vpop.f32.mrb[30].mxu1 }
 0xce8   :  { %v899_v8 = vmax.f32 %v894_v5, 0.0  ;;  %v2940_v16 = vpop.f32.mrb[31].mxu1 }
 0xcea   :  { %v900_v17 = vpack.c.bf16 %v899_v8, %v899_v8 }
 0xcec   :  { %2958 = vmatmul.mubr.bf16.vlgmr.msra.gmra.mrb[28].mxu0 %v900_v17 }
 0xced   :  { %2993 = vmatprep.mubr.msk.bf16.mxu0 %vm3549_vm1, %v3548_v0 }
 0xdbf   :  { %v935_v19 = vpop.f32.mrb[28].mxu0 }
 0xdc0   :  { %v943_v20 = vpack.c.bf16 %v935_v19, %v898_v18  ;;  %v2959_v21 = vpop.f32.mrb[29].mxu0  ;;  %v3468_v18 = vld [vmem:[%s4426_s8 + $0x8] sm:$0xff]   ;;  %v4032_v19 = vld [vmem:[%s4420_s2] sm:$0xff]  }
 0xdc1   :  { %v938_v22 = vpop.f32.mrb[30].mxu0  ;;  %v4048_v21 = vld [vmem:[%s4420_s2 + $0x10] sm:$0xff]  }
 0xdc2   :  { %v2960_v23 = vpop.f32.mrb[31].mxu0  ;;  %2962 = vmatpush3.bf16.msra.mxu1 %v943_v20  ;;  %v4041_v20 = vld [vmem:[%s4420_s2 + $0x8] sm:$0xff]  }
 0xdc3   :  { %2963 = vmatprep.subr.bf16.mxu1 %v3548_v0 }
 0xdc6   :  { %2964 = vmatpush3.bf16.msra.mxu1 %v3713_v30 }
 0xdc7   :  { %2969 = vmatprep.subr.bf16.mxu1 %v3548_v0 }
 0xdc9   :  { %2966 = vmatmul.mubr.msk.bf16.vlgmr.msra.gmra.mrb[32].mxu1 %vm226_vm5, %v3465_v24 }
 0xdca   :  { %2970 = vmatpush3.bf16.msra.mxu1 %v3633_v6  ;;  %2985 = vmatprep.mubr.msk.bf16.mxu1 %vm3549_vm1, %v3548_v0 }
 0xdcb   :  { %2971 = vmatprep.subr.bf16.mxu1 %v3548_v0 }
 0xdce   :  { %2972 = vmatpush3.bf16.msra.mxu1 %v3644_v9 }
 0xdcf   :  { %2973 = vmatprep.subr.bf16.mxu1 %v3548_v0 }
 0xdd2   :  { %2974 = vmatpush3.bf16.msra.mxu1 %v3652_v10 }
 0xdd3   :  { %2975 = vmatprep.subr.bf16.mxu1 %v3548_v0 }
 0xdd6   :  { %2976 = vmatpush3.bf16.msra.mxu1 %v3660_v11 }
 0xdd7   :  { %2977 = vmatprep.subr.bf16.mxu1 %v3548_v0 }
 0xdda   :  { %2978 = vmatpush3.bf16.msra.mxu1 %v3671_v12 }
 0xddb   :  { %2979 = vmatprep.subr.bf16.mxu1 %v3548_v0 }
 0xdde   :  { %2980 = vmatpush3.bf16.msra.mxu1 %v3680_v13 }
 0xddf   :  { %2981 = vmatprep.subr.bf16.mxu1 %v3548_v0 }
 0xde2   :  { %2982 = vmatpush3.bf16.msra.mxu1 %v3696_v14 }
 0xde3   :  { %2983 = vmatprep.subr.bf16.mxu1 %v3548_v0 }
 0xde6   :  { %2984 = vmatpush3.bf16.msra.mxu1 %v3705_v15 }
 0xde7   :  { %3017 = vmatprep.subr.bf16.mxu1 %v3548_v0 }
 0xe9c   :  { %v986_v25 = vpop.f32.mrb[32].mxu1 }
 0xe9d   :  { %v2967_v26 = vpop.f32.mrb[33].mxu1  ;;  %v993_v39 = vmax.f32 %v986_v25, 0.0 }
 0xe9e   :  { %v989_v27 = vpop.f32.mrb[34].mxu1 }
 0xe9f   :  { %v994_v28 = vmax.f32 %v989_v27, 0.0  ;;  %v2968_v29 = vpop.f32.mrb[35].mxu1 }
 0xea1   :  { %v995_v31 = vpack.c.bf16 %v994_v28, %v994_v28 }
 0xea3   :  { %2986 = vmatmul.mubr.bf16.vlgmr.msra.gmra.mrb[36].mxu1 %v995_v31 }
 0xea4   :  { %3021 = vmatprep.mubr.msk.bf16.mxu1 %vm3549_vm1, %v3548_v0 }
 0xf76   :  { %v1030_v40 = vpop.f32.mrb[36].mxu1 }
 0xf77   :  { %v3945_v41 = vpack.c.bf16 %v1030_v40, %v993_v39  ;;  %v2987_v42 = vpop.f32.mrb[37].mxu1  ;;  %v3469_v39 = vld [vmem:[%s4424_s6 + $0x28] sm:$0xff]   ;;  %v4082_v40 = vld [vmem:[%s4420_s2 + $0x18] sm:$0xff]  }
 0xf78   :  { %v1033_v43 = vpop.f32.mrb[38].mxu1  ;;  %v4096_v42 = vld [vmem:[%s4420_s2 + $0x28] sm:$0xff]  }
 0xf79   :  { %v2988_v45 = vpop.f32.mrb[39].mxu1  ;;  %2990 = vmatpush3.bf16.msra.mxu0 %v3945_v41 }
 0xf7a   :  { %2991 = vmatprep.subr.bf16.mxu0 %v3548_v0 }
 0xf7d   :  { %2992 = vmatpush3.bf16.msra.mxu0 %v3635_v7 }
 0xf7e   :  { %2997 = vmatprep.subr.bf16.mxu0 %v3548_v0 }
 0xf80   :  { %2994 = vmatmul.mubr.msk.bf16.vlgmr.msra.gmra.mrb[32].mxu0 %vm432_vm6, %v3466_v46 }
 0xf81   :  { %2998 = vmatpush3.bf16.msra.mxu0 %v3633_v6  ;;  %3013 = vmatprep.mubr.msk.bf16.mxu0 %vm3549_vm1, %v3548_v0 }
 0xf82   :  { %2999 = vmatprep.subr.bf16.mxu0 %v3548_v0 }
 0xf85   :  { %3000 = vmatpush3.bf16.msra.mxu0 %v3644_v9 }
 0xf86   :  { %3001 = vmatprep.subr.bf16.mxu0 %v3548_v0 }
 0xf89   :  { %3002 = vmatpush3.bf16.msra.mxu0 %v3652_v10 }
 0xf8a   :  { %3003 = vmatprep.subr.bf16.mxu0 %v3548_v0 }
 0xf8d   :  { %3004 = vmatpush3.bf16.msra.mxu0 %v3660_v11 }
 0xf8e   :  { %3005 = vmatprep.subr.bf16.mxu0 %v3548_v0 }
 0xf91   :  { %3006 = vmatpush3.bf16.msra.mxu0 %v3671_v12 }
 0xf92   :  { %3007 = vmatprep.subr.bf16.mxu0 %v3548_v0 }
 0xf95   :  { %3008 = vmatpush3.bf16.msra.mxu0 %v3680_v13 }
 0xf96   :  { %3009 = vmatprep.subr.bf16.mxu0 %v3548_v0 }
 0xf99   :  { %3010 = vmatpush3.bf16.msra.mxu0 %v3696_v14 }
 0xf9a   :  { %3011 = vmatprep.subr.bf16.mxu0 %v3548_v0 }
 0xf9d   :  { %3012 = vmatpush3.bf16.msra.mxu0 %v3705_v15 }
 0xf9e   :  { %3045 = vmatprep.subr.bf16.mxu0 %v3548_v0 }
0x1053   :  { %v1081_v47 = vpop.f32.mrb[32].mxu0 }
0x1054   :  { %v2995_v48 = vpop.f32.mrb[33].mxu0  ;;  %v1088_v53 = vmax.f32 %v1081_v47, 0.0 }
0x1055   :  { %v1084_v49 = vpop.f32.mrb[34].mxu0 }
0x1056   :  { %v1089_v50 = vmax.f32 %v1084_v49, 0.0  ;;  %v2996_v51 = vpop.f32.mrb[35].mxu0 }
0x1058   :  { %v1090_v52 = vpack.c.bf16 %v1089_v50, %v1089_v50 }
0x105a   :  { %3014 = vmatmul.mubr.bf16.vlgmr.msra.gmra.mrb[36].mxu0 %v1090_v52 }
0x105b   :  { %3046 = vmatpush3.bf16.msra.mxu0 %v3724_v32  ;;  %3061 = vmatprep.mubr.msk.bf16.mxu0 %vm3549_vm1, %v3548_v0 }
0x105c   :  { %3047 = vmatprep.subr.bf16.mxu0 %v3548_v0 }
0x105f   :  { %3048 = vmatpush3.bf16.msra.mxu0 %v3727_v33 }
0x1060   :  { %3049 = vmatprep.subr.bf16.mxu0 %v3548_v0 }
0x1063   :  { %3050 = vmatpush3.bf16.msra.mxu0 %v3731_v34 }
0x1064   :  { %3051 = vmatprep.subr.bf16.mxu0 %v3548_v0 }
0x1067   :  { %3052 = vmatpush3.bf16.msra.mxu0 %v3735_v35 }
0x1068   :  { %3053 = vmatprep.subr.bf16.mxu0 %v3548_v0 }
0x106b   :  { %3054 = vmatpush3.bf16.msra.mxu0 %v3739_v36 }
0x106c   :  { %3055 = vmatprep.subr.bf16.mxu0 %v3548_v0 }
0x106f   :  { %3056 = vmatpush3.bf16.msra.mxu0 %v3743_v37 }
0x1070   :  { %3057 = vmatprep.subr.bf16.mxu0 %v3548_v0 }
0x1073   :  { %3058 = vmatpush3.bf16.msra.mxu0 %v3747_v38 }
0x1074   :  { %3059 = vmatprep.subr.bf16.mxu0 %v3548_v0 }
0x1077   :  { %3060 = vmatpush3.bf16.msra.mxu0 %v3754_v44 }
0x1078   :  { %3095 = vmatprep.subr.bf16.mxu0 %v3548_v0 }
0x112d   :  { %v1125_v54 = vpop.f32.mrb[36].mxu0 }
0x112e   :  { %v1133_v55 = vpack.c.bf16 %v1125_v54, %v1088_v53  ;;  %v3015_v56 = vpop.f32.mrb[37].mxu0 }
0x112f   :  { %v1128_v57 = vpop.f32.mrb[38].mxu0  ;;  %v4140_v56 = vld [vmem:[%s4420_s2 + $0x38] sm:$0xff]  }
0x1130   :  { %v3016_v58 = vpop.f32.mrb[39].mxu0  ;;  %3018 = vmatpush3.bf16.msra.mxu1 %v1133_v55  ;;  %v4133_v55 = vld [vmem:[%s4420_s2 + $0x30] sm:$0xff]  }
0x1131   :  { %3019 = vmatprep.subr.bf16.mxu1 %v3548_v0 }
0x1134   :  { %3020 = vmatpush3.bf16.msra.mxu1 %v3713_v30 }
0x1135   :  { %3025 = vmatprep.subr.bf16.mxu1 %v3548_v0 }
0x1137   :  { %3022 = vmatmul.mubr.msk.bf16.vlgmr.msra.gmra.mrb[40].mxu1 %vm226_vm5, %v3467_v59 }
0x1138   :  { %3026 = vmatpush3.bf16.msra.mxu1 %v3633_v6  ;;  %3041 = vmatprep.mubr.msk.bf16.mxu1 %vm3549_vm1, %v3548_v0 }
0x1139   :  { %3027 = vmatprep.subr.bf16.mxu1 %v3548_v0 }
0x113c   :  { %3028 = vmatpush3.bf16.msra.mxu1 %v3644_v9 }
0x113d   :  { %3029 = vmatprep.subr.bf16.mxu1 %v3548_v0 }
0x1140   :  { %3030 = vmatpush3.bf16.msra.mxu1 %v3652_v10 }
0x1141   :  { %3031 = vmatprep.subr.bf16.mxu1 %v3548_v0 }
0x1144   :  { %3032 = vmatpush3.bf16.msra.mxu1 %v3660_v11 }
0x1145   :  { %3033 = vmatprep.subr.bf16.mxu1 %v3548_v0 }
0x1148   :  { %3034 = vmatpush3.bf16.msra.mxu1 %v3671_v12 }
0x1149   :  { %3035 = vmatprep.subr.bf16.mxu1 %v3548_v0 }
0x114c   :  { %3036 = vmatpush3.bf16.msra.mxu1 %v3680_v13 }
0x114d   :  { %3037 = vmatprep.subr.bf16.mxu1 %v3548_v0 }
0x1150   :  { %3038 = vmatpush3.bf16.msra.mxu1 %v3696_v14 }
0x1151   :  { %3039 = vmatprep.subr.bf16.mxu1 %v3548_v0 }
0x1154   :  { %3040 = vmatpush3.bf16.msra.mxu1 %v3705_v15 }
0x1155   :  { %3065 = vmatprep.subr.bf16.mxu1 %v3548_v0 }
0x120a   :  { %v1176_v6 = vpop.f32.mrb[40].mxu1 }
0x120b   :  { %v3023_v9 = vpop.f32.mrb[41].mxu1 }
0x120c   :  { %v1179_v10 = vpop.f32.mrb[42].mxu1 }
0x120d   :  { %v1183_v60 = vpack.c.bf16 %v1179_v10, %v1179_v10  ;;  %v3024_v61 = vpop.f32.mrb[43].mxu1 }
0x120f   :  { %3042 = vmatmul.mubr.bf16.vlgmr.msra.gmra.mrb[44].mxu1 %v1183_v60 }
0x1210   :  { %3066 = vmatpush3.bf16.msra.mxu1 %v3945_v41  ;;  %3071 = vmatprep.mubr.msk.bf16.mxu1 %vm3549_vm1, %v3548_v0  ;;  %v4089_v41 = vld [vmem:[%s4420_s2 + $0x20] sm:$0xff]  }
0x1211   :  { %3067 = vmatprep.subr.bf16.mxu1 %v3548_v0 }
0x12e2   :  { %v1218_v62 = vpop.f32.mrb[44].mxu1 }
0x12e3   :  { %v1224_v63 = vpack.c.bf16 %v1218_v62, %v1176_v6  ;;  %v3043_v1 = vpop.f32.mrb[45].mxu1 }
0x12e4   :  { %v1221_v2 = vpop.f32.mrb[46].mxu1 }
0x12e5   :  { %v3044_v3 = vpop.f32.mrb[47].mxu1  ;;  %3062 = vmatmul.mubr.bf16.vlgmr.msra.gmra.mrb[40].mxu0 %v1224_v63 }
0x12e6   :  { %3099 = vmatprep.mubr.msk.bf16.mxu0 %vm3549_vm1, %v3548_v0 }
0x13b8   :  { %v1259_v4 = vpop.f32.mrb[40].mxu0 }
0x13b9   :  { %v3063_v5 = vpop.f32.mrb[41].mxu0 }
0x13ba   :  { %v1262_v8 = vpop.f32.mrb[42].mxu0 }
0x13bb   :  { %v1268_v16 = vpack.c.bf16 %v1262_v8, %v1259_v4  ;;  %v3064_v17 = vpop.f32.mrb[43].mxu0 }
0x13bd   :  { %3068 = vmatpush3.bf16.msra.mxu1 %v1268_v16 }
0x13be   :  { %3069 = vmatprep.subr.bf16.mxu1 %v3548_v0 }
0x13c1   :  { %3070 = vmatpush3.bf16.msra.mxu1 %v3713_v30 }
0x13c2   :  { %3075 = vmatprep.subr.bf16.mxu1 %v3548_v0 }
0x13c4   :  { %3072 = vmatmul.mubr.msk.bf16.vlgmr.msra.gmra.mrb[48].mxu1 %vm853_vm7, %v3468_v18 }
0x13c5   :  { %3076 = vmatpush3.bf16.msra.mxu1 %v4032_v19  ;;  %3091 = vmatprep.mubr.msk.bf16.mxu1 %vm3549_vm1, %v3548_v0 }
0x13c6   :  { %3077 = vmatprep.subr.bf16.mxu1 %v3548_v0 }
0x13c9   :  { %3078 = vmatpush3.bf16.msra.mxu1 %v4041_v20 }
0x13ca   :  { %3079 = vmatprep.subr.bf16.mxu1 %v3548_v0 }
0x13cd   :  { %3080 = vmatpush3.bf16.msra.mxu1 %v4048_v21 }
0x13ce   :  { %3081 = vmatprep.subr.bf16.mxu1 %v3548_v0 }
0x13d1   :  { %3082 = vmatpush3.bf16.msra.mxu1 %v3660_v11 }
0x13d2   :  { %3083 = vmatprep.subr.bf16.mxu1 %v3548_v0 }
0x13d5   :  { %3084 = vmatpush3.bf16.msra.mxu1 %v3671_v12 }
0x13d6   :  { %3085 = vmatprep.subr.bf16.mxu1 %v3548_v0 }
0x13d9   :  { %3086 = vmatpush3.bf16.msra.mxu1 %v3680_v13 }
0x13da   :  { %3087 = vmatprep.subr.bf16.mxu1 %v3548_v0 }
0x13dd   :  { %3088 = vmatpush3.bf16.msra.mxu1 %v3696_v14 }
0x13de   :  { %3089 = vmatprep.subr.bf16.mxu1 %v3548_v0 }
0x13e1   :  { %3090 = vmatpush3.bf16.msra.mxu1 %v3705_v15 }
0x13e2   :  { %3123 = vmatprep.subr.bf16.mxu1 %v3548_v0 }
0x1497   :  { %v1311_v22 = vpop.f32.mrb[48].mxu1 }
0x1498   :  { %v3073_v11 = vpop.f32.mrb[49].mxu1  ;;  %v1318_v13 = vmax.f32 %v1311_v22, 0.0 }
0x1499   :  { %v1314_v23 = vpop.f32.mrb[50].mxu1  ;;  %v3472_v11 = vld [vmem:[%s4426_s8 + $0x10] sm:$0xff]  }
0x149a   :  { %v1319_v24 = vmax.f32 %v1314_v23, 0.0  ;;  %v3074_v25 = vpop.f32.mrb[51].mxu1 }
0x149c   :  { %v1320_v12 = vpack.c.bf16 %v1319_v24, %v1319_v24 }
0x149e   :  { %3092 = vmatmul.mubr.bf16.vlgmr.msra.gmra.mrb[52].mxu1 %v1320_v12 }
0x149f   :  { %3127 = vmatprep.mubr.msk.bf16.mxu1 %vm3549_vm1, %v3548_v0 }
0x1571   :  { %v1355_v26 = vpop.f32.mrb[52].mxu1 }
0x1572   :  { %v1363_v27 = vpack.c.bf16 %v1355_v26, %v1318_v13  ;;  %v3093_v28 = vpop.f32.mrb[53].mxu1 }
0x1573   :  { %v1358_v29 = vpop.f32.mrb[54].mxu1 }
0x1574   :  { %v3094_v31 = vpop.f32.mrb[55].mxu1  ;;  %3096 = vmatpush3.bf16.msra.mxu0 %v1363_v27 }
0x1575   :  { %3097 = vmatprep.subr.bf16.mxu0 %v3548_v0 }
0x1578   :  { %3098 = vmatpush3.bf16.msra.mxu0 %v3713_v30 }
0x1579   :  { %3103 = vmatprep.subr.bf16.mxu0 %v3548_v0 }
0x157b   :  { %3100 = vmatmul.mubr.msk.bf16.vlgmr.msra.gmra.mrb[44].mxu0 %vm226_vm5, %v3469_v39 }
0x157c   :  { %3104 = vmatpush3.bf16.msra.mxu0 %v4032_v19  ;;  %3119 = vmatprep.mubr.msk.bf16.mxu0 %vm3549_vm1, %v3548_v0 }
0x157d   :  { %3105 = vmatprep.subr.bf16.mxu0 %v3548_v0 }
0x1580   :  { %3106 = vmatpush3.bf16.msra.mxu0 %v4041_v20 }
0x1581   :  { %3107 = vmatprep.subr.bf16.mxu0 %v3548_v0 }
0x1584   :  { %3108 = vmatpush3.bf16.msra.mxu0 %v4048_v21 }
0x1585   :  { %3109 = vmatprep.subr.bf16.mxu0 %v3548_v0 }
0x1588   :  { %3110 = vmatpush3.bf16.msra.mxu0 %v4082_v40 }
0x1589   :  { %3111 = vmatprep.subr.bf16.mxu0 %v3548_v0 }
0x158c   :  { %3112 = vmatpush3.bf16.msra.mxu0 %v4089_v41 }
0x158d   :  { %3113 = vmatprep.subr.bf16.mxu0 %v3548_v0 }
0x1590   :  { %3114 = vmatpush3.bf16.msra.mxu0 %v4096_v42 }
0x1591   :  { %3115 = vmatprep.subr.bf16.mxu0 %v3548_v0 }
0x1594   :  { %3116 = vmatpush3.bf16.msra.mxu0 %v3696_v14 }
0x1595   :  { %3117 = vmatprep.subr.bf16.mxu0 %v3548_v0 }
0x1598   :  { %3118 = vmatpush3.bf16.msra.mxu0 %v3705_v15  ;;  %v3470_v15 = vld [vmem:[%s4425_s7 + $0x18] sm:$0xff]  }
0x1599   :  { %3151 = vmatprep.subr.bf16.mxu0 %v3548_v0 }
0x164e   :  { %v1406_v43 = vpop.f32.mrb[44].mxu0 }
0x164f   :  { %v3101_v45 = vpop.f32.mrb[45].mxu0  ;;  %v1413_v50 = vmax.f32 %v1406_v43, 0.0 }
0x1650   :  { %v1409_v46 = vpop.f32.mrb[46].mxu0  ;;  %v3473_v45 = vld [vmem:[%s4424_s6 + $0x38] sm:$0xff]  }
0x1651   :  { %v1414_v47 = vmax.f32 %v1409_v46, 0.0  ;;  %v3102_v48 = vpop.f32.mrb[47].mxu0 }
0x1653   :  { %v1415_v49 = vpack.c.bf16 %v1414_v47, %v1414_v47 }
0x1655   :  { %3120 = vmatmul.mubr.bf16.vlgmr.msra.gmra.mrb[48].mxu0 %v1415_v49 }
0x1656   :  { %3155 = vmatprep.mubr.msk.bf16.mxu0 %vm3549_vm1, %v3548_v0 }
0x1728   :  { %v1450_v51 = vpop.f32.mrb[48].mxu0 }
0x1729   :  { %v4106_v52 = vpack.c.bf16 %v1450_v51, %v1413_v50  ;;  %v3121_v14 = vpop.f32.mrb[49].mxu0 }
0x172a   :  { %v1453_v53 = vpop.f32.mrb[50].mxu0 }
0x172b   :  { %v3122_v54 = vpop.f32.mrb[51].mxu0  ;;  %3124 = vmatpush3.bf16.msra.mxu1 %v4106_v52 }
0x172c   :  { %3125 = vmatprep.subr.bf16.mxu1 %v3548_v0 }
0x172f   :  { %3126 = vmatpush3.bf16.msra.mxu1 %v3635_v7 }
0x1730   :  { %3131 = vmatprep.subr.bf16.mxu1 %v3548_v0 }
0x1732   :  { %3128 = vmatmul.mubr.msk.bf16.vlgmr.msra.gmra.mrb[56].mxu1 %vm432_vm6, %v3470_v15 }
0x1733   :  { %3132 = vmatpush3.bf16.msra.mxu1 %v4032_v19  ;;  %3147 = vmatprep.mubr.msk.bf16.mxu1 %vm3549_vm1, %v3548_v0 }
0x1734   :  { %3133 = vmatprep.subr.bf16.mxu1 %v3548_v0 }
0x1737   :  { %3134 = vmatpush3.bf16.msra.mxu1 %v4041_v20 }
0x1738   :  { %3135 = vmatprep.subr.bf16.mxu1 %v3548_v0 }
0x173b   :  { %3136 = vmatpush3.bf16.msra.mxu1 %v4048_v21 }
0x173c   :  { %3137 = vmatprep.subr.bf16.mxu1 %v3548_v0 }
0x173f   :  { %3138 = vmatpush3.bf16.msra.mxu1 %v4082_v40 }
0x1740   :  { %3139 = vmatprep.subr.bf16.mxu1 %v3548_v0 }
0x1743   :  { %3140 = vmatpush3.bf16.msra.mxu1 %v4089_v41 }
0x1744   :  { %3141 = vmatprep.subr.bf16.mxu1 %v3548_v0 }
0x1747   :  { %3142 = vmatpush3.bf16.msra.mxu1 %v4096_v42 }
0x1748   :  { %3143 = vmatprep.subr.bf16.mxu1 %v3548_v0 }
0x174b   :  { %3144 = vmatpush3.bf16.msra.mxu1 %v4133_v55 }
0x174c   :  { %3145 = vmatprep.subr.bf16.mxu1 %v3548_v0 }
0x174f   :  { %3146 = vmatpush3.bf16.msra.mxu1 %v4140_v56 }
0x1750   :  { %3179 = vmatprep.subr.bf16.mxu1 %v3548_v0 }
0x1805   :  { %v1501_v57 = vpop.f32.mrb[56].mxu1 }
0x1806   :  { %v3129_v58 = vpop.f32.mrb[57].mxu1 }
0x1807   :  { %v1504_v59 = vpop.f32.mrb[58].mxu1  ;;  %v3474_v58 = vld [vmem:[%s4425_s7 + $0x20] sm:$0xff]  }
0x1808   :  { %v1509_v6 = vmax.f32 %v1504_v59, 0.0  ;;  %v3130_v9 = vpop.f32.mrb[59].mxu1 }
0x180a   :  { %v1510_v10 = vpack.c.bf16 %v1509_v6, %v1509_v6 }
0x180c   :  { %3148 = vmatmul.mubr.bf16.vlgmr.msra.gmra.mrb[60].mxu1 %v1510_v10 }
0x180d   :  { %3180 = vmatpush3.bf16.msra.mxu1 %v3724_v32  ;;  %3195 = vmatprep.mubr.msk.bf16.mxu1 %vm3549_vm1, %v3548_v0  ;;  %v1508_v32 = vmax.f32 %v1501_v57, 0.0 }
0x180e   :  { %3181 = vmatprep.subr.bf16.mxu1 %v3548_v0 }
0x1811   :  { %3182 = vmatpush3.bf16.msra.mxu1 %v3727_v33 }
0x1812   :  { %3183 = vmatprep.subr.bf16.mxu1 %v3548_v0 }
0x1815   :  { %3184 = vmatpush3.bf16.msra.mxu1 %v3731_v34 }
0x1816   :  { %3185 = vmatprep.subr.bf16.mxu1 %v3548_v0 }
0x1819   :  { %3186 = vmatpush3.bf16.msra.mxu1 %v3735_v35 }
0x181a   :  { %3187 = vmatprep.subr.bf16.mxu1 %v3548_v0 }
0x181d   :  { %3188 = vmatpush3.bf16.msra.mxu1 %v3739_v36 }
0x181e   :  { %3189 = vmatprep.subr.bf16.mxu1 %v3548_v0 }
0x1821   :  { %3190 = vmatpush3.bf16.msra.mxu1 %v3743_v37  ;;  %v3471_v37 = vld [vmem:[%s4424_s6 + $0x30] sm:$0xff]  }
0x1822   :  { %3191 = vmatprep.subr.bf16.mxu1 %v3548_v0 }
0x1825   :  { %3192 = vmatpush3.bf16.msra.mxu1 %v3747_v38 }
0x1826   :  { %3193 = vmatprep.subr.bf16.mxu1 %v3548_v0 }
0x1829   :  { %3194 = vmatpush3.bf16.msra.mxu1 %v3754_v44 }
0x182a   :  { %3229 = vmatprep.subr.bf16.mxu1 %v3548_v0 }
0x18df   :  { %v1545_v33 = vpop.f32.mrb[60].mxu1 }
0x18e0   :  { %v1553_v34 = vpack.c.bf16 %v1545_v33, %v1508_v32  ;;  %v3149_v35 = vpop.f32.mrb[61].mxu1  ;;  %v3489_v33 = vld [vmem:[#allocation3] sm:$0xff]  }
0x18e1   :  { %v1548_v60 = vpop.f32.mrb[62].mxu1  ;;  %v3491_v35 = vld [vmem:[#allocation3 + $0x10] sm:$0xff]  }
0x18e2   :  { %v3150_v36 = vpop.f32.mrb[63].mxu1  ;;  %3152 = vmatpush3.bf16.msra.mxu0 %v1553_v34  ;;  %v3490_v34 = vld [vmem:[#allocation3 + $0x8] sm:$0xff]   ;;  %v3492_v60 = vld [vmem:[#allocation3 + $0x18] sm:$0xff]  }
0x18e3   :  { %3153 = vmatprep.subr.bf16.mxu0 %v3548_v0  ;;  %v3493_v36 = vld [vmem:[#allocation3 + $0x20] sm:$0xff]  }
0x18e6   :  { %3154 = vmatpush3.bf16.msra.mxu0 %v3713_v30 }
0x18e7   :  { %3159 = vmatprep.subr.bf16.mxu0 %v3548_v0 }
0x18e9   :  { %3156 = vmatmul.mubr.msk.bf16.vlgmr.msra.gmra.mrb[52].mxu0 %vm226_vm5, %v3471_v37  ;;  %v3494_v37 = vld [vmem:[#allocation3 + $0x28] sm:$0xff]  }
0x18ea   :  { %3160 = vmatpush3.bf16.msra.mxu0 %v4032_v19  ;;  %3175 = vmatprep.mubr.msk.bf16.mxu0 %vm3549_vm1, %v3548_v0 }
0x18eb   :  { %3161 = vmatprep.subr.bf16.mxu0 %v3548_v0 }
0x18ee   :  { %3162 = vmatpush3.bf16.msra.mxu0 %v4041_v20 }
0x18ef   :  { %3163 = vmatprep.subr.bf16.mxu0 %v3548_v0 }
0x18f2   :  { %3164 = vmatpush3.bf16.msra.mxu0 %v4048_v21 }
0x18f3   :  { %3165 = vmatprep.subr.bf16.mxu0 %v3548_v0 }
0x18f6   :  { %3166 = vmatpush3.bf16.msra.mxu0 %v4082_v40 }
0x18f7   :  { %3167 = vmatprep.subr.bf16.mxu0 %v3548_v0 }
0x18fa   :  { %3168 = vmatpush3.bf16.msra.mxu0 %v4089_v41 }
0x18fb   :  { %3169 = vmatprep.subr.bf16.mxu0 %v3548_v0 }
0x18fe   :  { %3170 = vmatpush3.bf16.msra.mxu0 %v4096_v42 }
0x18ff   :  { %3171 = vmatprep.subr.bf16.mxu0 %v3548_v0 }
0x1902   :  { %3172 = vmatpush3.bf16.msra.mxu0 %v4133_v55 }
0x1903   :  { %3173 = vmatprep.subr.bf16.mxu0 %v3548_v0 }
0x1906   :  { %3174 = vmatpush3.bf16.msra.mxu0 %v4140_v56 }
0x1907   :  { %3199 = vmatprep.subr.bf16.mxu0 %v3548_v0 }
0x19bc   :  { %v1596_v38 = vpop.f32.mrb[52].mxu0 }
0x19bd   :  { %v3157_v44 = vpop.f32.mrb[53].mxu0 }
0x19be   :  { %v1599_v61 = vpop.f32.mrb[54].mxu0  ;;  %v3496_v44 = vld [vmem:[#allocation3 + $0x38] sm:$0xff]  }
0x19bf   :  { %v1603_v62 = vpack.c.bf16 %v1599_v61, %v1599_v61  ;;  %v3158_v63 = vpop.f32.mrb[55].mxu0 }
0x19c1   :  { %3176 = vmatmul.mubr.bf16.vlgmr.msra.gmra.mrb[56].mxu0 %v1603_v62 }
0x19c2   :  { %3200 = vmatpush3.bf16.msra.mxu0 %v4106_v52  ;;  %3205 = vmatprep.mubr.msk.bf16.mxu0 %vm3549_vm1, %v3548_v0 }
0x19c3   :  { %3201 = vmatprep.subr.bf16.mxu0 %v3548_v0 }
0x1a94   :  { %v1638_v1 = vpop.f32.mrb[56].mxu0 }
0x1a95   :  { %v1644_v2 = vpack.c.bf16 %v1638_v1, %v1596_v38  ;;  %v3177_v3 = vpop.f32.mrb[57].mxu0  ;;  %v3495_v38 = vld [vmem:[#allocation3 + $0x30] sm:$0xff]  }
0x1a96   :  { %v1641_v4 = vpop.f32.mrb[58].mxu0 }
0x1a97   :  { %v3178_v5 = vpop.f32.mrb[59].mxu0  ;;  %3196 = vmatmul.mubr.bf16.vlgmr.msra.gmra.mrb[64].mxu1 %v1644_v2  ;;  %v3475_v4 = vld [vmem:[%s4424_s6 + $0x40] sm:$0xff]  }
0x1a98   :  { %3233 = vmatprep.mubr.msk.bf16.mxu1 %vm3549_vm1, %v3548_v0 }
0x1b6a   :  { %v1679_v8 = vpop.f32.mrb[64].mxu1 }
0x1b6b   :  { %v3197_v16 = vpop.f32.mrb[65].mxu1 }
0x1b6c   :  { %v1682_v17 = vpop.f32.mrb[66].mxu1 }
0x1b6d   :  { %v1688_v18 = vpack.c.bf16 %v1682_v17, %v1679_v8  ;;  %v3198_v22 = vpop.f32.mrb[67].mxu1 }
0x1b6f   :  { %3202 = vmatpush3.bf16.msra.mxu0 %v1688_v18 }
0x1b70   :  { %3203 = vmatprep.subr.bf16.mxu0 %v3548_v0 }
0x1b73   :  { %3204 = vmatpush3.bf16.msra.mxu0 %v3713_v30 }
0x1b74   :  { %3209 = vmatprep.subr.bf16.mxu0 %v3548_v0 }
0x1b76   :  { %3206 = vmatmul.mubr.msk.bf16.vlgmr.msra.gmra.mrb[60].mxu0 %vm853_vm7, %v3472_v11 }
0x1b77   :  { %3210 = vmatpush3.bf16.msra.mxu0 %v4032_v19  ;;  %3225 = vmatprep.mubr.msk.bf16.mxu0 %vm3549_vm1, %v3548_v0 }
0x1b78   :  { %3211 = vmatprep.subr.bf16.mxu0 %v3548_v0 }
0x1b7b   :  { %3212 = vmatpush3.bf16.msra.mxu0 %v4041_v20 }
0x1b7c   :  { %3213 = vmatprep.subr.bf16.mxu0 %v3548_v0 }
0x1b7f   :  { %3214 = vmatpush3.bf16.msra.mxu0 %v4048_v21 }
0x1b80   :  { %3215 = vmatprep.subr.bf16.mxu0 %v3548_v0 }
0x1b83   :  { %3216 = vmatpush3.bf16.msra.mxu0 %v4082_v40 }
0x1b84   :  { %3217 = vmatprep.subr.bf16.mxu0 %v3548_v0 }
0x1b87   :  { %3218 = vmatpush3.bf16.msra.mxu0 %v4089_v41 }
0x1b88   :  { %3219 = vmatprep.subr.bf16.mxu0 %v3548_v0 }
0x1b8b   :  { %3220 = vmatpush3.bf16.msra.mxu0 %v4096_v42 }
0x1b8c   :  { %3221 = vmatprep.subr.bf16.mxu0 %v3548_v0 }
0x1b8f   :  { %3222 = vmatpush3.bf16.msra.mxu0 %v4133_v55 }
0x1b90   :  { %3223 = vmatprep.subr.bf16.mxu0 %v3548_v0 }
0x1b93   :  { %3224 = vmatpush3.bf16.msra.mxu0 %v4140_v56 }
0x1b94   :  { %3257 = vmatprep.subr.bf16.mxu0 %v3548_v0 }
0x1c49   :  { %v1731_v23 = vpop.f32.mrb[60].mxu0 }
0x1c4a   :  { %v3207_v24 = vpop.f32.mrb[61].mxu0  ;;  %v1738_v27 = vmax.f32 %v1731_v23, 0.0 }
0x1c4b   :  { %v1734_v25 = vpop.f32.mrb[62].mxu0 }
0x1c4c   :  { %v1739_v12 = vmax.f32 %v1734_v25, 0.0  ;;  %v3208_v13 = vpop.f32.mrb[63].mxu0 }
0x1c4e   :  { %v1740_v26 = vpack.c.bf16 %v1739_v12, %v1739_v12 }
0x1c50   :  { %3226 = vmatmul.mubr.bf16.vlgmr.msra.gmra.mrb[64].mxu0 %v1740_v26 }
0x1c51   :  { %3261 = vmatprep.mubr.msk.bf16.mxu0 %vm3549_vm1, %v3548_v0 }
0x1d23   :  { %v1775_v28 = vpop.f32.mrb[64].mxu0 }
0x1d24   :  { %v1783_v29 = vpack.c.bf16 %v1775_v28, %v1738_v27  ;;  %v3227_v31 = vpop.f32.mrb[65].mxu0 }
0x1d25   :  { %v1778_v39 = vpop.f32.mrb[66].mxu0 }
0x1d26   :  { %v3228_v43 = vpop.f32.mrb[67].mxu0  ;;  %3230 = vmatpush3.bf16.msra.mxu1 %v1783_v29  ;;  %v3476_v29 = vld [vmem:[%s4426_s8 + $0x18] sm:$0xff]  }
0x1d27   :  { %3231 = vmatprep.subr.bf16.mxu1 %v3548_v0 }
0x1d2a   :  { %3232 = vmatpush3.bf16.msra.mxu1 %v3713_v30 }
0x1d2b   :  { %3237 = vmatprep.subr.bf16.mxu1 %v3548_v0 }
0x1d2d   :  { %3234 = vmatmul.mubr.msk.bf16.vlgmr.msra.gmra.mrb[68].mxu1 %vm226_vm5, %v3473_v45 }
0x1d2e   :  { %3238 = vmatpush3.bf16.msra.mxu1 %v4032_v19  ;;  %3253 = vmatprep.mubr.msk.bf16.mxu1 %vm3549_vm1, %v3548_v0 }
0x1d2f   :  { %3239 = vmatprep.subr.bf16.mxu1 %v3548_v0 }
0x1d32   :  { %3240 = vmatpush3.bf16.msra.mxu1 %v4041_v20 }
0x1d33   :  { %3241 = vmatprep.subr.bf16.mxu1 %v3548_v0 }
0x1d36   :  { %3242 = vmatpush3.bf16.msra.mxu1 %v4048_v21 }
0x1d37   :  { %3243 = vmatprep.subr.bf16.mxu1 %v3548_v0 }
0x1d3a   :  { %3244 = vmatpush3.bf16.msra.mxu1 %v4082_v40 }
0x1d3b   :  { %3245 = vmatprep.subr.bf16.mxu1 %v3548_v0 }
0x1d3e   :  { %3246 = vmatpush3.bf16.msra.mxu1 %v4089_v41 }
0x1d3f   :  { %3247 = vmatprep.subr.bf16.mxu1 %v3548_v0 }
0x1d42   :  { %3248 = vmatpush3.bf16.msra.mxu1 %v4096_v42 }
0x1d43   :  { %3249 = vmatprep.subr.bf16.mxu1 %v3548_v0 }
0x1d46   :  { %3250 = vmatpush3.bf16.msra.mxu1 %v4133_v55 }
0x1d47   :  { %3251 = vmatprep.subr.bf16.mxu1 %v3548_v0 }
0x1d4a   :  { %3252 = vmatpush3.bf16.msra.mxu1 %v4140_v56 }
0x1d4b   :  { %3285 = vmatprep.subr.bf16.mxu1 %v3548_v0 }
0x1e00   :  { %v1826_v46 = vpop.f32.mrb[68].mxu1 }
0x1e01   :  { %v3235_v47 = vpop.f32.mrb[69].mxu1  ;;  %v1833_v52 = vmax.f32 %v1826_v46, 0.0 }
0x1e02   :  { %v1829_v48 = vpop.f32.mrb[70].mxu1 }
0x1e03   :  { %v1834_v49 = vmax.f32 %v1829_v48, 0.0  ;;  %v3236_v50 = vpop.f32.mrb[71].mxu1 }
0x1e05   :  { %v1835_v51 = vpack.c.bf16 %v1834_v49, %v1834_v49 }
0x1e07   :  { %3254 = vmatmul.mubr.bf16.vlgmr.msra.gmra.mrb[72].mxu1 %v1835_v51 }
0x1e08   :  { %3289 = vmatprep.mubr.msk.bf16.mxu1 %vm3549_vm1, %v3548_v0 }
0x1eda   :  { %v1870_v14 = vpop.f32.mrb[72].mxu1 }
0x1edb   :  { %v4247_v53 = vpack.c.bf16 %v1870_v14, %v1833_v52  ;;  %v3255_v54 = vpop.f32.mrb[73].mxu1  ;;  %v2264_v52 = vld [vmem:[%s4422_s4] sm:$0xff]  ;;  %v2266_v14 = vld [vmem:[%s4422_s4 + $0x10] sm:$0xff] }
0x1edc   :  { %v1873_v15 = vpop.f32.mrb[74].mxu1 }
0x1edd   :  { %v3256_v57 = vpop.f32.mrb[75].mxu1  ;;  %3258 = vmatpush3.bf16.msra.mxu0 %v4247_v53  ;;  %v2267_v15 = vld [vmem:[%s4422_s4 + $0x18] sm:$0xff] }
0x1ede   :  { %3259 = vmatprep.subr.bf16.mxu0 %v3548_v0  ;;  %v3410_v57 = vpack.c.bf16 %v2267_v15, %v2266_v14 }
0x1ee1   :  { %3260 = vmatpush3.bf16.msra.mxu0 %v3635_v7 }
0x1ee2   :  { %3265 = vmatprep.subr.bf16.mxu0 %v3548_v0 }
0x1ee4   :  { %3262 = vmatmul.mubr.msk.bf16.vlgmr.msra.gmra.mrb[68].mxu0 %vm432_vm6, %v3474_v58  ;;  %v2268_v58 = vld [vmem:[%s4422_s4 + $0x20] sm:$0xff] }
0x1ee5   :  { %3266 = vmatpush3.bf16.msra.mxu0 %v4032_v19  ;;  %3281 = vmatprep.mubr.msk.bf16.mxu0 %vm3549_vm1, %v3548_v0 }
0x1ee6   :  { %3267 = vmatprep.subr.bf16.mxu0 %v3548_v0 }
0x1ee9   :  { %3268 = vmatpush3.bf16.msra.mxu0 %v4041_v20 }
0x1eea   :  { %3269 = vmatprep.subr.bf16.mxu0 %v3548_v0 }
0x1eed   :  { %3270 = vmatpush3.bf16.msra.mxu0 %v4048_v21 }
0x1eee   :  { %3271 = vmatprep.subr.bf16.mxu0 %v3548_v0 }
0x1ef1   :  { %3272 = vmatpush3.bf16.msra.mxu0 %v4082_v40 }
0x1ef2   :  { %3273 = vmatprep.subr.bf16.mxu0 %v3548_v0 }
0x1ef5   :  { %3274 = vmatpush3.bf16.msra.mxu0 %v4089_v41 }
0x1ef6   :  { %3275 = vmatprep.subr.bf16.mxu0 %v3548_v0 }
0x1ef9   :  { %3276 = vmatpush3.bf16.msra.mxu0 %v4096_v42 }
0x1efa   :  { %3277 = vmatprep.subr.bf16.mxu0 %v3548_v0 }
0x1efd   :  { %3278 = vmatpush3.bf16.msra.mxu0 %v4133_v55 }
0x1efe   :  { %3279 = vmatprep.subr.bf16.mxu0 %v3548_v0 }
0x1f01   :  { %3280 = vmatpush3.bf16.msra.mxu0 %v4140_v56 }
0x1f02   :  { %3313 = vmatprep.subr.bf16.mxu0 %v3548_v0 }
0x1fb7   :  { %v1921_v7 = vpop.f32.mrb[68].mxu0 }
0x1fb8   :  { %v3263_v59 = vpop.f32.mrb[69].mxu0  ;;  %v1928_v61 = vmax.f32 %v1921_v7, 0.0  ;;  %v2269_v7 = vld [vmem:[%s4422_s4 + $0x28] sm:$0xff] }
0x1fb9   :  { %v1924_v6 = vpop.f32.mrb[70].mxu0  ;;  %v3413_v59 = vpack.c.bf16 %v2269_v7, %v2268_v58 }
0x1fba   :  { %v1929_v9 = vmax.f32 %v1924_v6, 0.0  ;;  %v3264_v10 = vpop.f32.mrb[71].mxu0 }
0x1fbb   :  { %v2270_v10 = vld [vmem:[%s4422_s4 + $0x30] sm:$0xff] }
0x1fbc   :  { %v1930_v32 = vpack.c.bf16 %v1929_v9, %v1929_v9 }
0x1fbe   :  { %3282 = vmatmul.mubr.bf16.vlgmr.msra.gmra.mrb[72].mxu0 %v1930_v32  ;;  %v2271_v32 = vld [vmem:[%s4422_s4 + $0x38] sm:$0xff] }
0x1fbf   :  { %3314 = vmatpush3.bf16.msra.mxu0 %v3489_v33  ;;  %3329 = vmatprep.mubr.msk.bf16.mxu0 %vm3549_vm1, %v3548_v0  ;;  %v3416_v33 = vpack.c.bf16 %v2271_v32, %v2270_v10 }
0x1fc0   :  { %3315 = vmatprep.subr.bf16.mxu0 %v3548_v0 }
0x1fc3   :  { %3316 = vmatpush3.bf16.msra.mxu0 %v3490_v34  ;;  %v2272_v34 = vld [vmem:[%s4422_s4 + $0x40] sm:$0xff] }
0x1fc4   :  { %3317 = vmatprep.subr.bf16.mxu0 %v3548_v0 }
0x1fc7   :  { %3318 = vmatpush3.bf16.msra.mxu0 %v3491_v35  ;;  %v2273_v35 = vld [vmem:[%s4422_s4 + $0x48] sm:$0xff] }
0x1fc8   :  { %3319 = vmatprep.subr.bf16.mxu0 %v3548_v0 }
0x1fcb   :  { %3320 = vmatpush3.bf16.msra.mxu0 %v3492_v60  ;;  %v3419_v60 = vpack.c.bf16 %v2273_v35, %v2272_v34 }
0x1fcc   :  { %3321 = vmatprep.subr.bf16.mxu0 %v3548_v0 }
0x1fcf   :  { %3322 = vmatpush3.bf16.msra.mxu0 %v3493_v36  ;;  %v2274_v36 = vld [vmem:[%s4422_s4 + $0x50] sm:$0xff] }
0x1fd0   :  { %3323 = vmatprep.subr.bf16.mxu0 %v3548_v0 }
0x1fd3   :  { %3324 = vmatpush3.bf16.msra.mxu0 %v3494_v37  ;;  %v2275_v37 = vld [vmem:[%s4422_s4 + $0x58] sm:$0xff] }
0x1fd4   :  { %3325 = vmatprep.subr.bf16.mxu0 %v3548_v0 }
0x1fd7   :  { %3326 = vmatpush3.bf16.msra.mxu0 %v3495_v38  ;;  %v3422_v38 = vpack.c.bf16 %v2275_v37, %v2274_v36 }
0x1fd8   :  { %3327 = vmatprep.subr.bf16.mxu0 %v3548_v0 }
0x1fdb   :  { %3328 = vmatpush3.bf16.msra.mxu0 %v3496_v44  ;;  %v2276_v44 = vld [vmem:[%s4422_s4 + $0x60] sm:$0xff] }
0x1fdc   :  { %3363 = vmatprep.subr.bf16.mxu0 %v3548_v0 }
0x2091   :  { %v1965_v62 = vpop.f32.mrb[72].mxu0 }
0x2092   :  { %v1973_v63 = vpack.c.bf16 %v1965_v62, %v1928_v61  ;;  %v3283_v1 = vpop.f32.mrb[73].mxu0  ;;  %v2277_v61 = vld [vmem:[%s4422_s4 + $0x68] sm:$0xff] }
0x2093   :  { %v1968_v2 = vpop.f32.mrb[74].mxu0  ;;  %v3425_v62 = vpack.c.bf16 %v2277_v61, %v2276_v44  ;;  %v2278_v1 = vld [vmem:[%s4422_s4 + $0x70] sm:$0xff] }
0x2094   :  { %v3284_v3 = vpop.f32.mrb[75].mxu0  ;;  %3286 = vmatpush3.bf16.msra.mxu1 %v1973_v63  ;;  %v2279_v2 = vld [vmem:[%s4422_s4 + $0x78] sm:$0xff] }
0x2095   :  { %3287 = vmatprep.subr.bf16.mxu1 %v3548_v0 }
0x2098   :  { %3288 = vmatpush3.bf16.msra.mxu1 %v3713_v30 }
0x2099   :  { %3293 = vmatprep.subr.bf16.mxu1 %v3548_v0 }
0x209b   :  { %3290 = vmatmul.mubr.msk.bf16.vlgmr.msra.gmra.mrb[76].mxu1 %vm226_vm5, %v3475_v4  ;;  %v3428_v4 = vpack.c.bf16 %v2279_v2, %v2278_v1 }
0x209c   :  { %3294 = vmatpush3.bf16.msra.mxu1 %v4032_v19  ;;  %3309 = vmatprep.mubr.msk.bf16.mxu1 %vm3549_vm1, %v3548_v0 }
0x209d   :  { %3295 = vmatprep.subr.bf16.mxu1 %v3548_v0 }
0x20a0   :  { %3296 = vmatpush3.bf16.msra.mxu1 %v4041_v20 }
0x20a1   :  { %3297 = vmatprep.subr.bf16.mxu1 %v3548_v0 }
0x20a4   :  { %3298 = vmatpush3.bf16.msra.mxu1 %v4048_v21 }
0x20a5   :  { %3299 = vmatprep.subr.bf16.mxu1 %v3548_v0 }
0x20a8   :  { %3300 = vmatpush3.bf16.msra.mxu1 %v4082_v40 }
0x20a9   :  { %3301 = vmatprep.subr.bf16.mxu1 %v3548_v0 }
0x20ac   :  { %3302 = vmatpush3.bf16.msra.mxu1 %v4089_v41 }
0x20ad   :  { %3303 = vmatprep.subr.bf16.mxu1 %v3548_v0 }
0x20b0   :  { %3304 = vmatpush3.bf16.msra.mxu1 %v4096_v42 }
0x20b1   :  { %3305 = vmatprep.subr.bf16.mxu1 %v3548_v0 }
0x20b4   :  { %3306 = vmatpush3.bf16.msra.mxu1 %v4133_v55 }
0x20b5   :  { %3307 = vmatprep.subr.bf16.mxu1 %v3548_v0 }
0x20b8   :  { %3308 = vmatpush3.bf16.msra.mxu1 %v4140_v56 }
0x20b9   :  { %3333 = vmatprep.subr.bf16.mxu1 %v3548_v0 }
0x216e   :  { %v2016_v5 = vpop.f32.mrb[76].mxu1 }
0x216f   :  { %v3291_v8 = vpop.f32.mrb[77].mxu1 }
0x2170   :  { %v2019_v16 = vpop.f32.mrb[78].mxu1 }
0x2171   :  { %v2023_v17 = vpack.c.bf16 %v2019_v16, %v2019_v16  ;;  %v3292_v18 = vpop.f32.mrb[79].mxu1  ;;  %v2260_v16 = vstv %s4418_s0 }
0x2173   :  { %3310 = vmatmul.mubr.bf16.vlgmr.msra.gmra.mrb[80].mxu1 %v2023_v17 }
0x2174   :  { %3334 = vmatpush3.bf16.msra.mxu1 %v4247_v53  ;;  %3339 = vmatprep.mubr.msk.bf16.mxu1 %vm3549_vm1, %v3548_v0  ;;  %v3554_v53 = vmov 0.0|0.0  }
0x2175   :  { %3335 = vmatprep.subr.bf16.mxu1 %v3548_v0 }
0x2246   :  { %v2058_v22 = vpop.f32.mrb[80].mxu1 }
0x2247   :  { %v2064_v11 = vpack.c.bf16 %v2058_v22, %v2016_v5  ;;  %v3311_v23 = vpop.f32.mrb[81].mxu1 }
0x2248   :  { %v2061_v24 = vpop.f32.mrb[82].mxu1 }
0x2249   :  { %v3312_v25 = vpop.f32.mrb[83].mxu1  ;;  %3330 = vmatmul.mubr.bf16.vlgmr.msra.gmra.mrb[76].mxu0 %v2064_v11 }
0x224a   :  { %3367 = vmatprep.mubr.msk.bf16.mxu0 %vm3549_vm1, %v3548_v0 }
0x231c   :  { %v2099_v12 = vpop.f32.mrb[76].mxu0 }
0x231d   :  { %v3331_v13 = vpop.f32.mrb[77].mxu0 }
0x231e   :  { %v2102_v26 = vpop.f32.mrb[78].mxu0 }
0x231f   :  { %v2108_v27 = vpack.c.bf16 %v2102_v26, %v2099_v12  ;;  %v3332_v28 = vpop.f32.mrb[79].mxu0 }
0x2321   :  { %3336 = vmatpush3.bf16.msra.mxu1 %v2108_v27 }
0x2322   :  { %3337 = vmatprep.subr.bf16.mxu1 %v3548_v0 }
0x2325   :  { %3338 = vmatpush3.bf16.msra.mxu1 %v3713_v30 }
0x2326   :  { %3343 = vmatprep.subr.bf16.mxu1 %v3548_v0 }
0x2328   :  { %3340 = vmatmul.mubr.msk.bf16.vlgmr.msra.gmra.mrb[84].mxu1 %vm853_vm7, %v3476_v29 }
0x2329   :  { %3344 = vmatpush3.bf16.msra.mxu1 %v4032_v19  ;;  %3359 = vmatprep.mubr.msk.bf16.mxu1 %vm3549_vm1, %v3548_v0 }
0x232a   :  { %3345 = vmatprep.subr.bf16.mxu1 %v3548_v0 }
0x232d   :  { %3346 = vmatpush3.bf16.msra.mxu1 %v4041_v20 }
0x232e   :  { %3347 = vmatprep.subr.bf16.mxu1 %v3548_v0 }
0x2331   :  { %3348 = vmatpush3.bf16.msra.mxu1 %v4048_v21 }
0x2332   :  { %3349 = vmatprep.subr.bf16.mxu1 %v3548_v0 }
0x2335   :  { %3350 = vmatpush3.bf16.msra.mxu1 %v4082_v40 }
0x2336   :  { %3351 = vmatprep.subr.bf16.mxu1 %v3548_v0 }
0x2339   :  { %3352 = vmatpush3.bf16.msra.mxu1 %v4089_v41 }
0x233a   :  { %3353 = vmatprep.subr.bf16.mxu1 %v3548_v0 }
0x233d   :  { %3354 = vmatpush3.bf16.msra.mxu1 %v4096_v42 }
0x233e   :  { %3355 = vmatprep.subr.bf16.mxu1 %v3548_v0 }
0x2341   :  { %3356 = vmatpush3.bf16.msra.mxu1 %v4133_v55  ;;  %v2201_v55 = vld [vmem:[%s4424_s6 + $0x48] sm:$0x3] }
0x2342   :  { %3357 = vmatprep.subr.bf16.mxu1 %v3548_v0 }
0x2345   :  { %3358 = vmatpush3.bf16.msra.mxu1 %v4140_v56 }
0x23fb   :  { %v2151_v19 = vpop.f32.mrb[84].mxu1 }
0x23fc   :  { %v3341_v20 = vpop.f32.mrb[85].mxu1  ;;  %v2158_v41 = vmax.f32 %v2151_v19, 0.0 }
0x23fd   :  { %v2154_v21 = vpop.f32.mrb[86].mxu1 }
0x23fe   :  { %v2159_v40 = vmax.f32 %v2154_v21, 0.0  ;;  %v3342_v31 = vpop.f32.mrb[87].mxu1 }
0x2400   :  { %v2160_v39 = vpack.c.bf16 %v2159_v40, %v2159_v40 }
0x2402   :  { %3360 = vmatmul.mubr.bf16.vlgmr.msra.gmra.mrb[88].mxu1 %v2160_v39 }
0x24d5   :  { %v2195_v43 = vpop.f32.mrb[88].mxu1 }
0x24d6   :  { %v2202_v45 = vpack.c.bf16 %v2195_v43, %v2158_v41  ;;  %v3361_v46 = vpop.f32.mrb[89].mxu1 }
0x24d7   :  { %v2198_v42 = vpop.f32.mrb[90].mxu1 }
0x24d8   :  { %v3362_v47 = vpop.f32.mrb[91].mxu1  ;;  %3364 = vmatpush3.bf16.msra.mxu0 %v2202_v45 }
0x24d9   :  { %3365 = vmatprep.subr.bf16.mxu0 %v3548_v0 }
0x24dc   :  { %3366 = vmatpush3.bf16.msra.mxu0 %v3713_v30 }
0x24dd   :  { %3406 = vmatprep.subr.bf16.mxu0 %v3554_v53 }
0x24df   :  { %3368 = vmatmul.mubr.msk.bf16.vlgmr.msra.gmra.mrb[80].mxu0 %vm226_vm5, %v2201_v55 }
0x24e0   :  { %3403 = vmatprep.mubr.msk.f32.mxu0 %vm3549_vm1, %v3548_v0  ;;  %v2265_v0 = vld [vmem:[%s4422_s4 + $0x8] sm:$0xff]  ;;  %s3556_s4 = smov [#allocation6]  }
0x24e1   :  { %v3407_v54 = vpack.c.bf16 %v2265_v0, %v2264_v52 }
0x24e3   :  { %3408 = vmatpush3.bf16.msra.mxu0 %v3407_v54 }
0x24e4   :  { %3409 = vmatprep.subr.bf16.mxu0 %v3554_v53 }
0x24e7   :  { %3411 = vmatpush3.bf16.msra.mxu0 %v3410_v57 }
0x24e8   :  { %3412 = vmatprep.subr.bf16.mxu0 %v3554_v53 }
0x24eb   :  { %3414 = vmatpush3.bf16.msra.mxu0 %v3413_v59 }
0x24ec   :  { %3415 = vmatprep.subr.bf16.mxu0 %v3554_v53 }
0x24ef   :  { %3417 = vmatpush3.bf16.msra.mxu0 %v3416_v33 }
0x24f0   :  { %3418 = vmatprep.subr.bf16.mxu0 %v3554_v53 }
0x24f3   :  { %3420 = vmatpush3.bf16.msra.mxu0 %v3419_v60 }
0x24f4   :  { %3421 = vmatprep.subr.bf16.mxu0 %v3554_v53 }
0x24f7   :  { %3423 = vmatpush3.bf16.msra.mxu0 %v3422_v38 }
0x24f8   :  { %3424 = vmatprep.subr.bf16.mxu0 %v3554_v53 }
0x24fb   :  { %3426 = vmatpush3.bf16.msra.mxu0 %v3425_v62 }
0x24fc   :  { %3427 = vmatprep.subr.bf16.mxu0 %v3554_v53 }
0x24ff   :  { %3429 = vmatpush3.bf16.msra.mxu0 %v3428_v4 }
0x25b2   :  { %v4348_v56 = vpop.f32.mrb[80].mxu0 }
0x25b3   :  { %2247 = vrot.lane.b32.xlu0 %v4348_v56, %s3552_s24  ;;  %v3369_v48 = vpop.f32.mrb[81].mxu0 }
0x25b4   :  { %v2243_v49 = vpop.f32.mrb[82].mxu0 }
0x25b5   :  { %v3370_v50 = vpop.f32.mrb[83].mxu0 }
0x2625   :  { %v2248_v51 = vpop.permute.xlu0 %2247 }
0x2626   :  { %v2249_v30 = vmax.f32 %v4348_v56, %v2248_v51 }
0x2628   :  { %2250 = vrot.lane.b32.xlu0 %v2249_v30, %s3553_s25 }
0x269a   :  { %v2251_v6 = vpop.permute.xlu0 %2250 }
0x269b   :  { %v2252_v9 = vmax.f32 %v2249_v30, %v2251_v6 }
0x269d   :  { %2253 = vrot.lane.b32.xlu1 %v2252_v9, %s3555_s13 }
0x270f   :  { %v2254_v63 = vpop.permute.xlu1 %2253 }
0x2710   :  { %v2255_v3 = vmax.f32 %v2252_v9, %v2254_v63 }
0x2712   :  { %2256 = vrot.lane.b32.xlu1 %v2255_v3, %s3546_s19  ;;  %s2365_s19 = sshll.u32 %s3556_s4, 4  ;;  %s2366_s19 = int_to_ptr.vmem [resolvable:$true] %s2365_s19 }
0x2713   :  { %s3519_s0 = scalar_lea.vmem %s2366_s19, 128  ;;  %p3524_p9 = scmp.lt.s32.totalorder %s2366_s19, %s2366_s19 }
0x2714   :  { %p3520_p8 = scmp.ne.s32.totalorder %s2366_s19, %s3519_s0  ;;  %p3525_p10 = scmp.lt.s32.totalorder %s3519_s0, %s3519_s0 }
0x2716   :  { %p3526_p11 = por %p3525_p10, %p3524_p9 }
0x2718   :  { %p3527_p12 = pnand %p3526_p11, %p3520_p8 }
0x2784   :  { %v2257_v5 = vpop.permute.xlu1 %2256 }
0x2785   :  { %v2258_v8 = vmax.f32 %v2255_v3, %v2257_v5 }
0x2787   :  { %v2259_v17 = vsub.f32 %v4348_v56, %v2258_v8 }
0x2789   :  { %v2261_v18 = vmul.f32 %v2260_v16, %v2259_v17 }
0x278b   :  { %v2262_v22 = vmul.f32 1.442695, %v2261_v18 }
0x278d   :  { %3477 = vpow2.f32 %v2262_v22 }
0x2797   :  { %v3478_v11 = vpop.eup %3477 }
0x2798   :  { %3404 = vmatmul.mubr.f32.vlgmr.msra.gmra.mrb[84].mxu0 %v3478_v11 }
0x286b   :  { %v2346_v23 = vpop.f32.mrb[84].mxu0 }
0x286c   :  { %v2350_v24 = vmax.f32 %v2346_v23, 1e-30  ;;  %v3405_v25 = vpop.f32.mrb[85].mxu0 }
0x286e   :  { %3479 = vrcp.f32 %v2350_v24 }
0x2878   :  { %v3480_v12 = vpop.eup %3479 }
0x2879   :  { %v2352_v13 = vmul.f32 %v3480_v12, %v3478_v11 }
0x287b   :  { %v2354_v26 = vrot.slane %v2352_v13, 4 }
0x287d   :  { %v2357_v27 = vsel %vm2356_vm8, %v4348_v56, %v2354_v26 }
0x287e   :  { %2358 = vst [vmem:[#allocation6] sm:$0xff] %v2357_v27 }
0x287f   :  { %3530 = shalt.err (!%p3527_p12)
}
0x2880   :  { %s3531_s12 = scalar_lea.hbm %s4427_s9, 128 }
0x2881   :  { %p3532_p13 = scmp.ne.s32.totalorder %s4427_s9, %s3531_s12  ;;  %p3535_p0 = scmp.lt.u32.totalorder %s3531_s12, %s4427_s9 }
0x2883   :  { %p3537_p1 = pnand %p3535_p0, %p3532_p13 }
0x2885   :  { %3540 = shalt.err (!%p3537_p1)
}
0x2886   :  { %2368 = dma.vmem_to_hbm [thread:$0]  %s2366_s19, 128, %s4427_s9, [#allocation5]  }
0x2887   :  { %3543 = dma.done.wait [#allocation5], 128  }
0x2888   :  { %3544 = vsyncadd [#allocation5], 4294967168 }
0x2889   :  { %2372 = vsyncpa [#allocation4], 1 }
0x288a   :  { %2373 = vsyncpa [#allocation5], 1 }

</bundles_post_ra>
